<compile_context>
chip_gen: v7x
topology: tpu7x:2x2x1
jax: 0.10.0
libtpu: 0.0.40
codegen_flags: <defaults>
</compile_context>

<pallas_src>
import functools
import math

import jax
import jax.numpy as jnp
from jax.experimental import pallas as pl
from jax.experimental.pallas import tpu as pltpu


def _attention_kernel(x_ref, wqkv_ref, wout_ref, bout_ref, o_ref, *,
                      heads, dim_head, scale):
    # x_ref:    (1, n, dim)        one batch element
    # wqkv_ref: (dim, 4*inner)     torch to_qkv.weight.T   (VMEM resident)
    # wout_ref: (2*inner, dim)     torch to_out[0].weight.T (VMEM resident)
    # bout_ref: (1, dim)
    # o_ref:    (1, n, dim)
    n = x_ref.shape[1]
    dim = x_ref.shape[2]
    inner = heads * dim_head

    x = x_ref[0]                                                    # (n, dim)
    # Fused q/k/v/t projection: one (n, dim) x (dim, 4*inner) MXU matmul.
    qkvt = jnp.dot(x, wqkv_ref[...], preferred_element_type=jnp.float32)

    # Fixed positional attention attn2[i, j] = exp(-|i - j| / e), normalized
    # exactly like torch's `attn2 / attn2.sum(-1)` broadcast (element [i, j]
    # divided by the j-th sum; attn2 is symmetric so the axis-0 sum is the
    # bitwise-identical quantity and keeps the math 2-D friendly).
    ri = jax.lax.broadcasted_iota(jnp.int32, (n, n), 0)
    ci = jax.lax.broadcasted_iota(jnp.int32, (n, n), 1)
    tg = jnp.abs((ci - ri).astype(jnp.float32))
    a2 = jnp.exp(-tg / math.e)
    a2 = a2 / jnp.sum(a2, axis=0, keepdims=True)

    # Accumulate the output projection head by head. This folds
    # concat([attn1 @ v, attn2 @ t], -1) @ W_out into per-head
    # (n, dh) x (dh, dim) matmuls, avoiding any lane-dimension concatenate.
    acc = jnp.zeros((n, dim), jnp.float32)
    for h in range(heads):
        lo = h * dim_head
        q = qkvt[:, lo:lo + dim_head]
        k = qkvt[:, inner + lo:inner + lo + dim_head]
        v = qkvt[:, 2 * inner + lo:2 * inner + lo + dim_head]
        t = qkvt[:, 3 * inner + lo:3 * inner + lo + dim_head]

        # dots = q @ k^T * scale (contract on dh; no explicit transpose)
        dots = jax.lax.dot_general(q, k, (((1,), (1,)), ((), ())),
                                   preferred_element_type=jnp.float32) * scale
        dots = dots - jnp.max(dots, axis=-1, keepdims=True)
        e = jnp.exp(dots)
        attn1 = e / jnp.sum(e, axis=-1, keepdims=True)

        o1 = jnp.dot(attn1, v, preferred_element_type=jnp.float32)   # (n, dh)
        o2 = jnp.dot(a2, t, preferred_element_type=jnp.float32)      # (n, dh)

        # Rows of W_out that multiply [o1_h | o2_h] (64-row aligned slices).
        w1 = wout_ref[2 * h * dim_head:(2 * h + 1) * dim_head, :]
        w2 = wout_ref[(2 * h + 1) * dim_head:(2 * h + 2) * dim_head, :]
        acc = acc + jnp.dot(o1, w1, preferred_element_type=jnp.float32)
        acc = acc + jnp.dot(o2, w2, preferred_element_type=jnp.float32)

    # nn.Dropout(p=0.0) is the identity at inference.
    o_ref[0] = (acc + bout_ref[...]).astype(o_ref.dtype)


def attention_forward(x, w_qkv, w_out, b_out, *, heads=8, dim_head=64):
    """x: (b, n, dim) -> (b, n, dim). Weights are stored transposed vs torch."""
    b, n, dim = x.shape
    inner = heads * dim_head
    assert w_qkv.shape == (dim, 4 * inner)
    assert w_out.shape == (2 * inner, dim)
    scale = float(dim_head) ** -0.5
    b_out2d = b_out.reshape(1, dim)

    flops = b * (2 * n * dim * 4 * inner
                 + heads * 6 * n * n * dim_head
                 + 2 * n * (2 * inner) * dim)
    bytes_accessed = 4 * (x.size + b * n * dim + w_qkv.size + w_out.size + dim)
    cost = pl.CostEstimate(flops=flops,
                           transcendentals=b * (heads + 1) * n * n,
                           bytes_accessed=bytes_accessed)

    kernel = functools.partial(_attention_kernel, heads=heads,
                               dim_head=dim_head, scale=scale)
    return pl.pallas_call(
        kernel,
        out_shape=jax.ShapeDtypeStruct((b, n, dim), x.dtype),
        grid_spec=pltpu.PrefetchScalarGridSpec(
            num_scalar_prefetch=0,
            grid=(b,),
            in_specs=[
                pl.BlockSpec((1, n, dim), lambda i: (i, 0, 0)),      # x tile
                pl.BlockSpec((dim, 4 * inner), lambda i: (0, 0)),    # W_qkv
                pl.BlockSpec((2 * inner, dim), lambda i: (0, 0)),    # W_out
                pl.BlockSpec((1, dim), lambda i: (0, 0)),            # b_out
            ],
            out_specs=pl.BlockSpec((1, n, dim), lambda i: (i, 0, 0)),
        ),
        compiler_params=pltpu.CompilerParams(
            dimension_semantics=("parallel",)),
        cost_estimate=cost,
    )(x, w_qkv, w_out, b_out2d)


def attention_ref(x, w_qkv, w_out, b_out, *, heads, dim_head):
    """Plain-JAX mirror of the PyTorch forward (for validation)."""
    b, n, dim = x.shape
    inner = heads * dim_head
    qkvt = x @ w_qkv
    q, k, v, t = jnp.split(qkvt, 4, axis=-1)

    def heads_first(z):
        return z.reshape(b, n, heads, dim_head).transpose(0, 2, 1, 3)

    q, k, v, t = map(heads_first, (q, k, v, t))
    dots = jnp.einsum('bhnd,bhmd->bhnm', q, k) * (float(dim_head) ** -0.5)
    attn1 = jax.nn.softmax(dots, axis=-1)

    idx = jnp.arange(1, n + 1, dtype=jnp.float32)
    tg = jnp.abs(idx[None, :] - idx[:, None])
    a2 = jnp.exp(-tg / jnp.exp(jnp.float32(1.0)))
    a2 = a2 / a2.sum(-1)                     # same broadcast as torch

    out1 = jnp.einsum('bhnm,bhmd->bhnd', attn1, v)
    out2 = jnp.einsum('nm,bhmd->bhnd', a2, t)
    out = jnp.concatenate([out1, out2], axis=-1)          # (b, h, n, 2*dh)
    out = out.transpose(0, 2, 1, 3).reshape(b, n, 2 * inner)
    return out @ w_out + b_out


if __name__ == "__main__":
    key = jax.random.PRNGKey(0)
    kx, kq, ko, kb = jax.random.split(key, 4)

    batch, seq, dim = 2, 8, 128          # dim=128 keeps the output lane-dense
    heads, dim_head = 8, 64              # module defaults -> inner_dim = 512
    inner = heads * dim_head

    x = jax.random.normal(kx, (batch, seq, dim), jnp.float32)
    w_qkv = jax.random.normal(kq, (dim, 4 * inner), jnp.float32) * (dim ** -0.5)
    w_out = jax.random.normal(ko, (2 * inner, dim), jnp.float32) * ((2 * inner) ** -0.5)
    b_out = jax.random.normal(kb, (dim,), jnp.float32) * 0.02

    y = attention_forward(x, w_qkv, w_out, b_out, heads=heads, dim_head=dim_head)
    y = jax.block_until_ready(y)

    y_ref = attention_ref(x, w_qkv, w_out, b_out, heads=heads, dim_head=dim_head)
    assert y.shape == (batch, seq, dim)
    assert jnp.allclose(y, y_ref, atol=1e-4, rtol=1e-4)

    print("KERNEL_OK")
</pallas_src>

<mosaic_0001>
module attributes {stable_mosaic.version = 11 : i64} {
  func.func @_attention_kernel(%arg0: i32, %arg1: memref<1x8x128xf32, #tpu.memory_space<vmem>>, %arg2: memref<128x2048xf32, #tpu.memory_space<vmem>>, %arg3: memref<1024x128xf32, #tpu.memory_space<vmem>>, %arg4: memref<1x128xf32, #tpu.memory_space<vmem>>, %arg5: memref<1x8x128xf32, #tpu.memory_space<vmem>>) attributes {dimension_semantics = [#tpu.dimension_semantics<parallel>], iteration_bounds = array<i64: 2>, scalar_prefetch = 0 : i64, scratch_operands = 0 : i64, tpu.core_type = #tpu.core_type<tc>, window_params = [{transform_indices = @transform_0, window_bounds = array<i64: 1, 8, 128>}, {pipeline_mode = #tpu.pipeline_mode<synchronous>, transform_indices = @transform_1, window_bounds = array<i64: 128, 2048>}, {pipeline_mode = #tpu.pipeline_mode<synchronous>, transform_indices = @transform_2, window_bounds = array<i64: 1024, 128>}, {pipeline_mode = #tpu.pipeline_mode<synchronous>, transform_indices = @transform_3, window_bounds = array<i64: 1, 128>}, {transform_indices = @transform_4, window_bounds = array<i64: 1, 8, 128>}]} {
    %c0 = arith.constant 0 : index
    %c0_0 = arith.constant 0 : index
    %c0_1 = arith.constant 0 : index
    %0 = vector.load %arg1[%c0, %c0_0, %c0_1] : memref<1x8x128xf32, #tpu.memory_space<vmem>>, vector<1x8x128xf32>
    %1 = vector.shape_cast %0 : vector<1x8x128xf32> to vector<8x128xf32>
    %c0_2 = arith.constant 0 : index
    %c0_3 = arith.constant 0 : index
    %2 = vector.load %arg2[%c0_2, %c0_3] : memref<128x2048xf32, #tpu.memory_space<vmem>>, vector<128x2048xf32>
    %cst = arith.constant dense<0.000000e+00> : vector<8x2048xf32>
    %3 = tpu.matmul %1, %2, %cst {dimension_numbers = #tpu.dot_dimension_numbers<[1], [0], [0], [1], [0, 0, 1, 1], [], []>} : vector<8x128xf32>, vector<128x2048xf32>, vector<8x2048xf32> -> vector<8x2048xf32>
    %4 = tpu.iota {dimensions = array<i32: 0>} : vector<8x8xi32>
    %5 = tpu.iota {dimensions = array<i32: 1>} : vector<8x8xi32>
    %6 = arith.subi %5, %4 : vector<8x8xi32>
    %7 = arith.sitofp %6 : vector<8x8xi32> to vector<8x8xf32>
    %8 = math.absf %7 : vector<8x8xf32>
    %cst_4 = arith.constant 0.000000e+00 : f32
    %9 = vector.broadcast %cst_4 : f32 to vector<8x8xf32>
    %10 = arith.subf %9, %8 : vector<8x8xf32>
    %cst_5 = arith.constant 2.71828175 : f32
    %11 = vector.broadcast %cst_5 : f32 to vector<8x8xf32>
    %12 = arith.divf %10, %11 : vector<8x8xf32>
    %13 = math.exp %12 : vector<8x8xf32>
    %cst_6 = arith.constant dense<0.000000e+00> : vector<8xf32>
    %14 = vector.multi_reduction <add>, %13, %cst_6 [0] : vector<8x8xf32> to vector<8xf32>
    %15 = vector.shape_cast %14 : vector<8xf32> to vector<1x8xf32>
    %16 = vector.broadcast %15 : vector<1x8xf32> to vector<8x8xf32>
    %17 = arith.divf %13, %16 : vector<8x8xf32>
    %cst_7 = arith.constant 0.000000e+00 : f32
    %18 = vector.broadcast %cst_7 : f32 to vector<8x128xf32>
    %19 = vector.extract_strided_slice %3 {offsets = [0, 0], sizes = [8, 64], strides = [1, 1]} : vector<8x2048xf32> to vector<8x64xf32>
    %20 = vector.extract_strided_slice %3 {offsets = [0, 512], sizes = [8, 64], strides = [1, 1]} : vector<8x2048xf32> to vector<8x64xf32>
    %21 = vector.extract_strided_slice %3 {offsets = [0, 1024], sizes = [8, 64], strides = [1, 1]} : vector<8x2048xf32> to vector<8x64xf32>
    %22 = vector.extract_strided_slice %3 {offsets = [0, 1536], sizes = [8, 64], strides = [1, 1]} : vector<8x2048xf32> to vector<8x64xf32>
    %cst_8 = arith.constant dense<0.000000e+00> : vector<8x8xf32>
    %23 = tpu.matmul %19, %20, %cst_8 {dimension_numbers = #tpu.dot_dimension_numbers<[1], [1], [0], [0], [0, 0, 1, 0], [], []>} : vector<8x64xf32>, vector<8x64xf32>, vector<8x8xf32> -> vector<8x8xf32>
    %cst_9 = arith.constant 1.250000e-01 : f32
    %24 = vector.broadcast %cst_9 : f32 to vector<8x8xf32>
    %25 = arith.mulf %23, %24 : vector<8x8xf32>
    %cst_10 = arith.constant dense<0xFF800000> : vector<8xf32>
    %26 = vector.multi_reduction <maximumf>, %25, %cst_10 [1] : vector<8x8xf32> to vector<8xf32>
    %27 = vector.shape_cast %26 : vector<8xf32> to vector<8x1xf32>
    %28 = vector.broadcast %27 : vector<8x1xf32> to vector<8x8xf32>
    %29 = arith.subf %25, %28 : vector<8x8xf32>
    %30 = math.exp %29 : vector<8x8xf32>
    %cst_11 = arith.constant dense<0.000000e+00> : vector<8xf32>
    %31 = vector.multi_reduction <add>, %30, %cst_11 [1] : vector<8x8xf32> to vector<8xf32>
    %32 = vector.shape_cast %31 : vector<8xf32> to vector<8x1xf32>
    %33 = vector.broadcast %32 : vector<8x1xf32> to vector<8x8xf32>
    %34 = arith.divf %30, %33 : vector<8x8xf32>
    %cst_12 = arith.constant dense<0.000000e+00> : vector<8x64xf32>
    %35 = tpu.matmul %34, %21, %cst_12 {dimension_numbers = #tpu.dot_dimension_numbers<[1], [0], [0], [1], [0, 0, 1, 1], [], []>} : vector<8x8xf32>, vector<8x64xf32>, vector<8x64xf32> -> vector<8x64xf32>
    %cst_13 = arith.constant dense<0.000000e+00> : vector<8x64xf32>
    %36 = tpu.matmul %17, %22, %cst_13 {dimension_numbers = #tpu.dot_dimension_numbers<[1], [0], [0], [1], [0, 0, 1, 1], [], []>} : vector<8x8xf32>, vector<8x64xf32>, vector<8x64xf32> -> vector<8x64xf32>
    %c0_14 = arith.constant 0 : index
    %c0_15 = arith.constant 0 : index
    %37 = vector.load %arg3[%c0_14, %c0_15] : memref<1024x128xf32, #tpu.memory_space<vmem>>, vector<64x128xf32>
    %c64 = arith.constant 64 : index
    %c0_16 = arith.constant 0 : index
    %38 = vector.load %arg3[%c64, %c0_16] : memref<1024x128xf32, #tpu.memory_space<vmem>>, vector<64x128xf32>
    %cst_17 = arith.constant dense<0.000000e+00> : vector<8x128xf32>
    %39 = tpu.matmul %35, %37, %cst_17 {dimension_numbers = #tpu.dot_dimension_numbers<[1], [0], [0], [1], [0, 0, 1, 1], [], []>} : vector<8x64xf32>, vector<64x128xf32>, vector<8x128xf32> -> vector<8x128xf32>
    %40 = arith.addf %18, %39 : vector<8x128xf32>
    %cst_18 = arith.constant dense<0.000000e+00> : vector<8x128xf32>
    %41 = tpu.matmul %36, %38, %cst_18 {dimension_numbers = #tpu.dot_dimension_numbers<[1], [0], [0], [1], [0, 0, 1, 1], [], []>} : vector<8x64xf32>, vector<64x128xf32>, vector<8x128xf32> -> vector<8x128xf32>
    %42 = arith.addf %40, %41 : vector<8x128xf32>
    %43 = vector.extract_strided_slice %3 {offsets = [0, 64], sizes = [8, 64], strides = [1, 1]} : vector<8x2048xf32> to vector<8x64xf32>
    %44 = vector.extract_strided_slice %3 {offsets = [0, 576], sizes = [8, 64], strides = [1, 1]} : vector<8x2048xf32> to vector<8x64xf32>
    %45 = vector.extract_strided_slice %3 {offsets = [0, 1088], sizes = [8, 64], strides = [1, 1]} : vector<8x2048xf32> to vector<8x64xf32>
    %46 = vector.extract_strided_slice %3 {offsets = [0, 1600], sizes = [8, 64], strides = [1, 1]} : vector<8x2048xf32> to vector<8x64xf32>
    %cst_19 = arith.constant dense<0.000000e+00> : vector<8x8xf32>
    %47 = tpu.matmul %43, %44, %cst_19 {dimension_numbers = #tpu.dot_dimension_numbers<[1], [1], [0], [0], [0, 0, 1, 0], [], []>} : vector<8x64xf32>, vector<8x64xf32>, vector<8x8xf32> -> vector<8x8xf32>
    %cst_20 = arith.constant 1.250000e-01 : f32
    %48 = vector.broadcast %cst_20 : f32 to vector<8x8xf32>
    %49 = arith.mulf %47, %48 : vector<8x8xf32>
    %cst_21 = arith.constant dense<0xFF800000> : vector<8xf32>
    %50 = vector.multi_reduction <maximumf>, %49, %cst_21 [1] : vector<8x8xf32> to vector<8xf32>
    %51 = vector.shape_cast %50 : vector<8xf32> to vector<8x1xf32>
    %52 = vector.broadcast %51 : vector<8x1xf32> to vector<8x8xf32>
    %53 = arith.subf %49, %52 : vector<8x8xf32>
    %54 = math.exp %53 : vector<8x8xf32>
    %cst_22 = arith.constant dense<0.000000e+00> : vector<8xf32>
    %55 = vector.multi_reduction <add>, %54, %cst_22 [1] : vector<8x8xf32> to vector<8xf32>
    %56 = vector.shape_cast %55 : vector<8xf32> to vector<8x1xf32>
    %57 = vector.broadcast %56 : vector<8x1xf32> to vector<8x8xf32>
    %58 = arith.divf %54, %57 : vector<8x8xf32>
    %cst_23 = arith.constant dense<0.000000e+00> : vector<8x64xf32>
    %59 = tpu.matmul %58, %45, %cst_23 {dimension_numbers = #tpu.dot_dimension_numbers<[1], [0], [0], [1], [0, 0, 1, 1], [], []>} : vector<8x8xf32>, vector<8x64xf32>, vector<8x64xf32> -> vector<8x64xf32>
    %cst_24 = arith.constant dense<0.000000e+00> : vector<8x64xf32>
    %60 = tpu.matmul %17, %46, %cst_24 {dimension_numbers = #tpu.dot_dimension_numbers<[1], [0], [0], [1], [0, 0, 1, 1], [], []>} : vector<8x8xf32>, vector<8x64xf32>, vector<8x64xf32> -> vector<8x64xf32>
    %c128 = arith.constant 128 : index
    %c0_25 = arith.constant 0 : index
    %61 = vector.load %arg3[%c128, %c0_25] : memref<1024x128xf32, #tpu.memory_space<vmem>>, vector<64x128xf32>
    %c192 = arith.constant 192 : index
    %c0_26 = arith.constant 0 : index
    %62 = vector.load %arg3[%c192, %c0_26] : memref<1024x128xf32, #tpu.memory_space<vmem>>, vector<64x128xf32>
    %cst_27 = arith.constant dense<0.000000e+00> : vector<8x128xf32>
    %63 = tpu.matmul %59, %61, %cst_27 {dimension_numbers = #tpu.dot_dimension_numbers<[1], [0], [0], [1], [0, 0, 1, 1], [], []>} : vector<8x64xf32>, vector<64x128xf32>, vector<8x128xf32> -> vector<8x128xf32>
    %64 = arith.addf %42, %63 : vector<8x128xf32>
    %cst_28 = arith.constant dense<0.000000e+00> : vector<8x128xf32>
    %65 = tpu.matmul %60, %62, %cst_28 {dimension_numbers = #tpu.dot_dimension_numbers<[1], [0], [0], [1], [0, 0, 1, 1], [], []>} : vector<8x64xf32>, vector<64x128xf32>, vector<8x128xf32> -> vector<8x128xf32>
    %66 = arith.addf %64, %65 : vector<8x128xf32>
    %67 = vector.extract_strided_slice %3 {offsets = [0, 128], sizes = [8, 64], strides = [1, 1]} : vector<8x2048xf32> to vector<8x64xf32>
    %68 = vector.extract_strided_slice %3 {offsets = [0, 640], sizes = [8, 64], strides = [1, 1]} : vector<8x2048xf32> to vector<8x64xf32>
    %69 = vector.extract_strided_slice %3 {offsets = [0, 1152], sizes = [8, 64], strides = [1, 1]} : vector<8x2048xf32> to vector<8x64xf32>
    %70 = vector.extract_strided_slice %3 {offsets = [0, 1664], sizes = [8, 64], strides = [1, 1]} : vector<8x2048xf32> to vector<8x64xf32>
    %cst_29 = arith.constant dense<0.000000e+00> : vector<8x8xf32>
    %71 = tpu.matmul %67, %68, %cst_29 {dimension_numbers = #tpu.dot_dimension_numbers<[1], [1], [0], [0], [0, 0, 1, 0], [], []>} : vector<8x64xf32>, vector<8x64xf32>, vector<8x8xf32> -> vector<8x8xf32>
    %cst_30 = arith.constant 1.250000e-01 : f32
    %72 = vector.broadcast %cst_30 : f32 to vector<8x8xf32>
    %73 = arith.mulf %71, %72 : vector<8x8xf32>
    %cst_31 = arith.constant dense<0xFF800000> : vector<8xf32>
    %74 = vector.multi_reduction <maximumf>, %73, %cst_31 [1] : vector<8x8xf32> to vector<8xf32>
    %75 = vector.shape_cast %74 : vector<8xf32> to vector<8x1xf32>
    %76 = vector.broadcast %75 : vector<8x1xf32> to vector<8x8xf32>
    %77 = arith.subf %73, %76 : vector<8x8xf32>
    %78 = math.exp %77 : vector<8x8xf32>
    %cst_32 = arith.constant dense<0.000000e+00> : vector<8xf32>
    %79 = vector.multi_reduction <add>, %78, %cst_32 [1] : vector<8x8xf32> to vector<8xf32>
    %80 = vector.shape_cast %79 : vector<8xf32> to vector<8x1xf32>
    %81 = vector.broadcast %80 : vector<8x1xf32> to vector<8x8xf32>
    %82 = arith.divf %78, %81 : vector<8x8xf32>
    %cst_33 = arith.constant dense<0.000000e+00> : vector<8x64xf32>
    %83 = tpu.matmul %82, %69, %cst_33 {dimension_numbers = #tpu.dot_dimension_numbers<[1], [0], [0], [1], [0, 0, 1, 1], [], []>} : vector<8x8xf32>, vector<8x64xf32>, vector<8x64xf32> -> vector<8x64xf32>
    %cst_34 = arith.constant dense<0.000000e+00> : vector<8x64xf32>
    %84 = tpu.matmul %17, %70, %cst_34 {dimension_numbers = #tpu.dot_dimension_numbers<[1], [0], [0], [1], [0, 0, 1, 1], [], []>} : vector<8x8xf32>, vector<8x64xf32>, vector<8x64xf32> -> vector<8x64xf32>
    %c256 = arith.constant 256 : index
    %c0_35 = arith.constant 0 : index
    %85 = vector.load %arg3[%c256, %c0_35] : memref<1024x128xf32, #tpu.memory_space<vmem>>, vector<64x128xf32>
    %c320 = arith.constant 320 : index
    %c0_36 = arith.constant 0 : index
    %86 = vector.load %arg3[%c320, %c0_36] : memref<1024x128xf32, #tpu.memory_space<vmem>>, vector<64x128xf32>
    %cst_37 = arith.constant dense<0.000000e+00> : vector<8x128xf32>
    %87 = tpu.matmul %83, %85, %cst_37 {dimension_numbers = #tpu.dot_dimension_numbers<[1], [0], [0], [1], [0, 0, 1, 1], [], []>} : vector<8x64xf32>, vector<64x128xf32>, vector<8x128xf32> -> vector<8x128xf32>
    %88 = arith.addf %66, %87 : vector<8x128xf32>
    %cst_38 = arith.constant dense<0.000000e+00> : vector<8x128xf32>
    %89 = tpu.matmul %84, %86, %cst_38 {dimension_numbers = #tpu.dot_dimension_numbers<[1], [0], [0], [1], [0, 0, 1, 1], [], []>} : vector<8x64xf32>, vector<64x128xf32>, vector<8x128xf32> -> vector<8x128xf32>
    %90 = arith.addf %88, %89 : vector<8x128xf32>
    %91 = vector.extract_strided_slice %3 {offsets = [0, 192], sizes = [8, 64], strides = [1, 1]} : vector<8x2048xf32> to vector<8x64xf32>
    %92 = vector.extract_strided_slice %3 {offsets = [0, 704], sizes = [8, 64], strides = [1, 1]} : vector<8x2048xf32> to vector<8x64xf32>
    %93 = vector.extract_strided_slice %3 {offsets = [0, 1216], sizes = [8, 64], strides = [1, 1]} : vector<8x2048xf32> to vector<8x64xf32>
    %94 = vector.extract_strided_slice %3 {offsets = [0, 1728], sizes = [8, 64], strides = [1, 1]} : vector<8x2048xf32> to vector<8x64xf32>
    %cst_39 = arith.constant dense<0.000000e+00> : vector<8x8xf32>
    %95 = tpu.matmul %91, %92, %cst_39 {dimension_numbers = #tpu.dot_dimension_numbers<[1], [1], [0], [0], [0, 0, 1, 0], [], []>} : vector<8x64xf32>, vector<8x64xf32>, vector<8x8xf32> -> vector<8x8xf32>
    %cst_40 = arith.constant 1.250000e-01 : f32
    %96 = vector.broadcast %cst_40 : f32 to vector<8x8xf32>
    %97 = arith.mulf %95, %96 : vector<8x8xf32>
    %cst_41 = arith.constant dense<0xFF800000> : vector<8xf32>
    %98 = vector.multi_reduction <maximumf>, %97, %cst_41 [1] : vector<8x8xf32> to vector<8xf32>
    %99 = vector.shape_cast %98 : vector<8xf32> to vector<8x1xf32>
    %100 = vector.broadcast %99 : vector<8x1xf32> to vector<8x8xf32>
    %101 = arith.subf %97, %100 : vector<8x8xf32>
    %102 = math.exp %101 : vector<8x8xf32>
    %cst_42 = arith.constant dense<0.000000e+00> : vector<8xf32>
    %103 = vector.multi_reduction <add>, %102, %cst_42 [1] : vector<8x8xf32> to vector<8xf32>
    %104 = vector.shape_cast %103 : vector<8xf32> to vector<8x1xf32>
    %105 = vector.broadcast %104 : vector<8x1xf32> to vector<8x8xf32>
    %106 = arith.divf %102, %105 : vector<8x8xf32>
    %cst_43 = arith.constant dense<0.000000e+00> : vector<8x64xf32>
    %107 = tpu.matmul %106, %93, %cst_43 {dimension_numbers = #tpu.dot_dimension_numbers<[1], [0], [0], [1], [0, 0, 1, 1], [], []>} : vector<8x8xf32>, vector<8x64xf32>, vector<8x64xf32> -> vector<8x64xf32>
    %cst_44 = arith.constant dense<0.000000e+00> : vector<8x64xf32>
    %108 = tpu.matmul %17, %94, %cst_44 {dimension_numbers = #tpu.dot_dimension_numbers<[1], [0], [0], [1], [0, 0, 1, 1], [], []>} : vector<8x8xf32>, vector<8x64xf32>, vector<8x64xf32> -> vector<8x64xf32>
    %c384 = arith.constant 384 : index
    %c0_45 = arith.constant 0 : index
    %109 = vector.load %arg3[%c384, %c0_45] : memref<1024x128xf32, #tpu.memory_space<vmem>>, vector<64x128xf32>
    %c448 = arith.constant 448 : index
    %c0_46 = arith.constant 0 : index
    %110 = vector.load %arg3[%c448, %c0_46] : memref<1024x128xf32, #tpu.memory_space<vmem>>, vector<64x128xf32>
    %cst_47 = arith.constant dense<0.000000e+00> : vector<8x128xf32>
    %111 = tpu.matmul %107, %109, %cst_47 {dimension_numbers = #tpu.dot_dimension_numbers<[1], [0], [0], [1], [0, 0, 1, 1], [], []>} : vector<8x64xf32>, vector<64x128xf32>, vector<8x128xf32> -> vector<8x128xf32>
    %112 = arith.addf %90, %111 : vector<8x128xf32>
    %cst_48 = arith.constant dense<0.000000e+00> : vector<8x128xf32>
    %113 = tpu.matmul %108, %110, %cst_48 {dimension_numbers = #tpu.dot_dimension_numbers<[1], [0], [0], [1], [0, 0, 1, 1], [], []>} : vector<8x64xf32>, vector<64x128xf32>, vector<8x128xf32> -> vector<8x128xf32>
    %114 = arith.addf %112, %113 : vector<8x128xf32>
    %115 = vector.extract_strided_slice %3 {offsets = [0, 256], sizes = [8, 64], strides = [1, 1]} : vector<8x2048xf32> to vector<8x64xf32>
    %116 = vector.extract_strided_slice %3 {offsets = [0, 768], sizes = [8, 64], strides = [1, 1]} : vector<8x2048xf32> to vector<8x64xf32>
    %117 = vector.extract_strided_slice %3 {offsets = [0, 1280], sizes = [8, 64], strides = [1, 1]} : vector<8x2048xf32> to vector<8x64xf32>
    %118 = vector.extract_strided_slice %3 {offsets = [0, 1792], sizes = [8, 64], strides = [1, 1]} : vector<8x2048xf32> to vector<8x64xf32>
    %cst_49 = arith.constant dense<0.000000e+00> : vector<8x8xf32>
    %119 = tpu.matmul %115, %116, %cst_49 {dimension_numbers = #tpu.dot_dimension_numbers<[1], [1], [0], [0], [0, 0, 1, 0], [], []>} : vector<8x64xf32>, vector<8x64xf32>, vector<8x8xf32> -> vector<8x8xf32>
    %cst_50 = arith.constant 1.250000e-01 : f32
    %120 = vector.broadcast %cst_50 : f32 to vector<8x8xf32>
    %121 = arith.mulf %119, %120 : vector<8x8xf32>
    %cst_51 = arith.constant dense<0xFF800000> : vector<8xf32>
    %122 = vector.multi_reduction <maximumf>, %121, %cst_51 [1] : vector<8x8xf32> to vector<8xf32>
    %123 = vector.shape_cast %122 : vector<8xf32> to vector<8x1xf32>
    %124 = vector.broadcast %123 : vector<8x1xf32> to vector<8x8xf32>
    %125 = arith.subf %121, %124 : vector<8x8xf32>
    %126 = math.exp %125 : vector<8x8xf32>
    %cst_52 = arith.constant dense<0.000000e+00> : vector<8xf32>
    %127 = vector.multi_reduction <add>, %126, %cst_52 [1] : vector<8x8xf32> to vector<8xf32>
    %128 = vector.shape_cast %127 : vector<8xf32> to vector<8x1xf32>
    %129 = vector.broadcast %128 : vector<8x1xf32> to vector<8x8xf32>
    %130 = arith.divf %126, %129 : vector<8x8xf32>
    %cst_53 = arith.constant dense<0.000000e+00> : vector<8x64xf32>
    %131 = tpu.matmul %130, %117, %cst_53 {dimension_numbers = #tpu.dot_dimension_numbers<[1], [0], [0], [1], [0, 0, 1, 1], [], []>} : vector<8x8xf32>, vector<8x64xf32>, vector<8x64xf32> -> vector<8x64xf32>
    %cst_54 = arith.constant dense<0.000000e+00> : vector<8x64xf32>
    %132 = tpu.matmul %17, %118, %cst_54 {dimension_numbers = #tpu.dot_dimension_numbers<[1], [0], [0], [1], [0, 0, 1, 1], [], []>} : vector<8x8xf32>, vector<8x64xf32>, vector<8x64xf32> -> vector<8x64xf32>
    %c512 = arith.constant 512 : index
    %c0_55 = arith.constant 0 : index
    %133 = vector.load %arg3[%c512, %c0_55] : memref<1024x128xf32, #tpu.memory_space<vmem>>, vector<64x128xf32>
    %c576 = arith.constant 576 : index
    %c0_56 = arith.constant 0 : index
    %134 = vector.load %arg3[%c576, %c0_56] : memref<1024x128xf32, #tpu.memory_space<vmem>>, vector<64x128xf32>
    %cst_57 = arith.constant dense<0.000000e+00> : vector<8x128xf32>
    %135 = tpu.matmul %131, %133, %cst_57 {dimension_numbers = #tpu.dot_dimension_numbers<[1], [0], [0], [1], [0, 0, 1, 1], [], []>} : vector<8x64xf32>, vector<64x128xf32>, vector<8x128xf32> -> vector<8x128xf32>
    %136 = arith.addf %114, %135 : vector<8x128xf32>
    %cst_58 = arith.constant dense<0.000000e+00> : vector<8x128xf32>
    %137 = tpu.matmul %132, %134, %cst_58 {dimension_numbers = #tpu.dot_dimension_numbers<[1], [0], [0], [1], [0, 0, 1, 1], [], []>} : vector<8x64xf32>, vector<64x128xf32>, vector<8x128xf32> -> vector<8x128xf32>
    %138 = arith.addf %136, %137 : vector<8x128xf32>
    %139 = vector.extract_strided_slice %3 {offsets = [0, 320], sizes = [8, 64], strides = [1, 1]} : vector<8x2048xf32> to vector<8x64xf32>
    %140 = vector.extract_strided_slice %3 {offsets = [0, 832], sizes = [8, 64], strides = [1, 1]} : vector<8x2048xf32> to vector<8x64xf32>
    %141 = vector.extract_strided_slice %3 {offsets = [0, 1344], sizes = [8, 64], strides = [1, 1]} : vector<8x2048xf32> to vector<8x64xf32>
    %142 = vector.extract_strided_slice %3 {offsets = [0, 1856], sizes = [8, 64], strides = [1, 1]} : vector<8x2048xf32> to vector<8x64xf32>
    %cst_59 = arith.constant dense<0.000000e+00> : vector<8x8xf32>
    %143 = tpu.matmul %139, %140, %cst_59 {dimension_numbers = #tpu.dot_dimension_numbers<[1], [1], [0], [0], [0, 0, 1, 0], [], []>} : vector<8x64xf32>, vector<8x64xf32>, vector<8x8xf32> -> vector<8x8xf32>
    %cst_60 = arith.constant 1.250000e-01 : f32
    %144 = vector.broadcast %cst_60 : f32 to vector<8x8xf32>
    %145 = arith.mulf %143, %144 : vector<8x8xf32>
    %cst_61 = arith.constant dense<0xFF800000> : vector<8xf32>
    %146 = vector.multi_reduction <maximumf>, %145, %cst_61 [1] : vector<8x8xf32> to vector<8xf32>
    %147 = vector.shape_cast %146 : vector<8xf32> to vector<8x1xf32>
    %148 = vector.broadcast %147 : vector<8x1xf32> to vector<8x8xf32>
    %149 = arith.subf %145, %148 : vector<8x8xf32>
    %150 = math.exp %149 : vector<8x8xf32>
    %cst_62 = arith.constant dense<0.000000e+00> : vector<8xf32>
    %151 = vector.multi_reduction <add>, %150, %cst_62 [1] : vector<8x8xf32> to vector<8xf32>
    %152 = vector.shape_cast %151 : vector<8xf32> to vector<8x1xf32>
    %153 = vector.broadcast %152 : vector<8x1xf32> to vector<8x8xf32>
    %154 = arith.divf %150, %153 : vector<8x8xf32>
    %cst_63 = arith.constant dense<0.000000e+00> : vector<8x64xf32>
    %155 = tpu.matmul %154, %141, %cst_63 {dimension_numbers = #tpu.dot_dimension_numbers<[1], [0], [0], [1], [0, 0, 1, 1], [], []>} : vector<8x8xf32>, vector<8x64xf32>, vector<8x64xf32> -> vector<8x64xf32>
    %cst_64 = arith.constant dense<0.000000e+00> : vector<8x64xf32>
    %156 = tpu.matmul %17, %142, %cst_64 {dimension_numbers = #tpu.dot_dimension_numbers<[1], [0], [0], [1], [0, 0, 1, 1], [], []>} : vector<8x8xf32>, vector<8x64xf32>, vector<8x64xf32> -> vector<8x64xf32>
    %c640 = arith.constant 640 : index
    %c0_65 = arith.constant 0 : index
    %157 = vector.load %arg3[%c640, %c0_65] : memref<1024x128xf32, #tpu.memory_space<vmem>>, vector<64x128xf32>
    %c704 = arith.constant 704 : index
    %c0_66 = arith.constant 0 : index
    %158 = vector.load %arg3[%c704, %c0_66] : memref<1024x128xf32, #tpu.memory_space<vmem>>, vector<64x128xf32>
    %cst_67 = arith.constant dense<0.000000e+00> : vector<8x128xf32>
    %159 = tpu.matmul %155, %157, %cst_67 {dimension_numbers = #tpu.dot_dimension_numbers<[1], [0], [0], [1], [0, 0, 1, 1], [], []>} : vector<8x64xf32>, vector<64x128xf32>, vector<8x128xf32> -> vector<8x128xf32>
    %160 = arith.addf %138, %159 : vector<8x128xf32>
    %cst_68 = arith.constant dense<0.000000e+00> : vector<8x128xf32>
    %161 = tpu.matmul %156, %158, %cst_68 {dimension_numbers = #tpu.dot_dimension_numbers<[1], [0], [0], [1], [0, 0, 1, 1], [], []>} : vector<8x64xf32>, vector<64x128xf32>, vector<8x128xf32> -> vector<8x128xf32>
    %162 = arith.addf %160, %161 : vector<8x128xf32>
    %163 = vector.extract_strided_slice %3 {offsets = [0, 384], sizes = [8, 64], strides = [1, 1]} : vector<8x2048xf32> to vector<8x64xf32>
    %164 = vector.extract_strided_slice %3 {offsets = [0, 896], sizes = [8, 64], strides = [1, 1]} : vector<8x2048xf32> to vector<8x64xf32>
    %165 = vector.extract_strided_slice %3 {offsets = [0, 1408], sizes = [8, 64], strides = [1, 1]} : vector<8x2048xf32> to vector<8x64xf32>
    %166 = vector.extract_strided_slice %3 {offsets = [0, 1920], sizes = [8, 64], strides = [1, 1]} : vector<8x2048xf32> to vector<8x64xf32>
    %cst_69 = arith.constant dense<0.000000e+00> : vector<8x8xf32>
    %167 = tpu.matmul %163, %164, %cst_69 {dimension_numbers = #tpu.dot_dimension_numbers<[1], [1], [0], [0], [0, 0, 1, 0], [], []>} : vector<8x64xf32>, vector<8x64xf32>, vector<8x8xf32> -> vector<8x8xf32>
    %cst_70 = arith.constant 1.250000e-01 : f32
    %168 = vector.broadcast %cst_70 : f32 to vector<8x8xf32>
    %169 = arith.mulf %167, %168 : vector<8x8xf32>
    %cst_71 = arith.constant dense<0xFF800000> : vector<8xf32>
    %170 = vector.multi_reduction <maximumf>, %169, %cst_71 [1] : vector<8x8xf32> to vector<8xf32>
    %171 = vector.shape_cast %170 : vector<8xf32> to vector<8x1xf32>
    %172 = vector.broadcast %171 : vector<8x1xf32> to vector<8x8xf32>
    %173 = arith.subf %169, %172 : vector<8x8xf32>
    %174 = math.exp %173 : vector<8x8xf32>
    %cst_72 = arith.constant dense<0.000000e+00> : vector<8xf32>
    %175 = vector.multi_reduction <add>, %174, %cst_72 [1] : vector<8x8xf32> to vector<8xf32>
    %176 = vector.shape_cast %175 : vector<8xf32> to vector<8x1xf32>
    %177 = vector.broadcast %176 : vector<8x1xf32> to vector<8x8xf32>
    %178 = arith.divf %174, %177 : vector<8x8xf32>
    %cst_73 = arith.constant dense<0.000000e+00> : vector<8x64xf32>
    %179 = tpu.matmul %178, %165, %cst_73 {dimension_numbers = #tpu.dot_dimension_numbers<[1], [0], [0], [1], [0, 0, 1, 1], [], []>} : vector<8x8xf32>, vector<8x64xf32>, vector<8x64xf32> -> vector<8x64xf32>
    %cst_74 = arith.constant dense<0.000000e+00> : vector<8x64xf32>
    %180 = tpu.matmul %17, %166, %cst_74 {dimension_numbers = #tpu.dot_dimension_numbers<[1], [0], [0], [1], [0, 0, 1, 1], [], []>} : vector<8x8xf32>, vector<8x64xf32>, vector<8x64xf32> -> vector<8x64xf32>
    %c768 = arith.constant 768 : index
    %c0_75 = arith.constant 0 : index
    %181 = vector.load %arg3[%c768, %c0_75] : memref<1024x128xf32, #tpu.memory_space<vmem>>, vector<64x128xf32>
    %c832 = arith.constant 832 : index
    %c0_76 = arith.constant 0 : index
    %182 = vector.load %arg3[%c832, %c0_76] : memref<1024x128xf32, #tpu.memory_space<vmem>>, vector<64x128xf32>
    %cst_77 = arith.constant dense<0.000000e+00> : vector<8x128xf32>
    %183 = tpu.matmul %179, %181, %cst_77 {dimension_numbers = #tpu.dot_dimension_numbers<[1], [0], [0], [1], [0, 0, 1, 1], [], []>} : vector<8x64xf32>, vector<64x128xf32>, vector<8x128xf32> -> vector<8x128xf32>
    %184 = arith.addf %162, %183 : vector<8x128xf32>
    %cst_78 = arith.constant dense<0.000000e+00> : vector<8x128xf32>
    %185 = tpu.matmul %180, %182, %cst_78 {dimension_numbers = #tpu.dot_dimension_numbers<[1], [0], [0], [1], [0, 0, 1, 1], [], []>} : vector<8x64xf32>, vector<64x128xf32>, vector<8x128xf32> -> vector<8x128xf32>
    %186 = arith.addf %184, %185 : vector<8x128xf32>
    %187 = vector.extract_strided_slice %3 {offsets = [0, 448], sizes = [8, 64], strides = [1, 1]} : vector<8x2048xf32> to vector<8x64xf32>
    %188 = vector.extract_strided_slice %3 {offsets = [0, 960], sizes = [8, 64], strides = [1, 1]} : vector<8x2048xf32> to vector<8x64xf32>
    %189 = vector.extract_strided_slice %3 {offsets = [0, 1472], sizes = [8, 64], strides = [1, 1]} : vector<8x2048xf32> to vector<8x64xf32>
    %190 = vector.extract_strided_slice %3 {offsets = [0, 1984], sizes = [8, 64], strides = [1, 1]} : vector<8x2048xf32> to vector<8x64xf32>
    %cst_79 = arith.constant dense<0.000000e+00> : vector<8x8xf32>
    %191 = tpu.matmul %187, %188, %cst_79 {dimension_numbers = #tpu.dot_dimension_numbers<[1], [1], [0], [0], [0, 0, 1, 0], [], []>} : vector<8x64xf32>, vector<8x64xf32>, vector<8x8xf32> -> vector<8x8xf32>
    %cst_80 = arith.constant 1.250000e-01 : f32
    %192 = vector.broadcast %cst_80 : f32 to vector<8x8xf32>
    %193 = arith.mulf %191, %192 : vector<8x8xf32>
    %cst_81 = arith.constant dense<0xFF800000> : vector<8xf32>
    %194 = vector.multi_reduction <maximumf>, %193, %cst_81 [1] : vector<8x8xf32> to vector<8xf32>
    %195 = vector.shape_cast %194 : vector<8xf32> to vector<8x1xf32>
    %196 = vector.broadcast %195 : vector<8x1xf32> to vector<8x8xf32>
    %197 = arith.subf %193, %196 : vector<8x8xf32>
    %198 = math.exp %197 : vector<8x8xf32>
    %cst_82 = arith.constant dense<0.000000e+00> : vector<8xf32>
    %199 = vector.multi_reduction <add>, %198, %cst_82 [1] : vector<8x8xf32> to vector<8xf32>
    %200 = vector.shape_cast %199 : vector<8xf32> to vector<8x1xf32>
    %201 = vector.broadcast %200 : vector<8x1xf32> to vector<8x8xf32>
    %202 = arith.divf %198, %201 : vector<8x8xf32>
    %cst_83 = arith.constant dense<0.000000e+00> : vector<8x64xf32>
    %203 = tpu.matmul %202, %189, %cst_83 {dimension_numbers = #tpu.dot_dimension_numbers<[1], [0], [0], [1], [0, 0, 1, 1], [], []>} : vector<8x8xf32>, vector<8x64xf32>, vector<8x64xf32> -> vector<8x64xf32>
    %cst_84 = arith.constant dense<0.000000e+00> : vector<8x64xf32>
    %204 = tpu.matmul %17, %190, %cst_84 {dimension_numbers = #tpu.dot_dimension_numbers<[1], [0], [0], [1], [0, 0, 1, 1], [], []>} : vector<8x8xf32>, vector<8x64xf32>, vector<8x64xf32> -> vector<8x64xf32>
    %c896 = arith.constant 896 : index
    %c0_85 = arith.constant 0 : index
    %205 = vector.load %arg3[%c896, %c0_85] : memref<1024x128xf32, #tpu.memory_space<vmem>>, vector<64x128xf32>
    %c960 = arith.constant 960 : index
    %c0_86 = arith.constant 0 : index
    %206 = vector.load %arg3[%c960, %c0_86] : memref<1024x128xf32, #tpu.memory_space<vmem>>, vector<64x128xf32>
    %cst_87 = arith.constant dense<0.000000e+00> : vector<8x128xf32>
    %207 = tpu.matmul %203, %205, %cst_87 {dimension_numbers = #tpu.dot_dimension_numbers<[1], [0], [0], [1], [0, 0, 1, 1], [], []>} : vector<8x64xf32>, vector<64x128xf32>, vector<8x128xf32> -> vector<8x128xf32>
    %208 = arith.addf %186, %207 : vector<8x128xf32>
    %cst_88 = arith.constant dense<0.000000e+00> : vector<8x128xf32>
    %209 = tpu.matmul %204, %206, %cst_88 {dimension_numbers = #tpu.dot_dimension_numbers<[1], [0], [0], [1], [0, 0, 1, 1], [], []>} : vector<8x64xf32>, vector<64x128xf32>, vector<8x128xf32> -> vector<8x128xf32>
    %210 = arith.addf %208, %209 : vector<8x128xf32>
    %c0_89 = arith.constant 0 : index
    %c0_90 = arith.constant 0 : index
    %211 = vector.load %arg4[%c0_89, %c0_90] : memref<1x128xf32, #tpu.memory_space<vmem>>, vector<1x128xf32>
    %212 = vector.broadcast %211 : vector<1x128xf32> to vector<8x128xf32>
    %213 = arith.addf %210, %212 : vector<8x128xf32>
    %c0_91 = arith.constant 0 : index
    %c0_92 = arith.constant 0 : index
    %c0_93 = arith.constant 0 : index
    %214 = vector.load %arg5[%c0_91, %c0_92, %c0_93] : memref<1x8x128xf32, #tpu.memory_space<vmem>>, vector<1x8x128xf32>
    %215 = vector.shape_cast %214 : vector<1x8x128xf32> to vector<8x128xf32>
    %216 = vector.shape_cast %213 : vector<8x128xf32> to vector<1x8x128xf32>
    tpu.vector_store %arg5[%c0_91, %c0_92, %c0_93], %216 {strides = array<i32>} : memref<1x8x128xf32, #tpu.memory_space<vmem>>, vector<1x8x128xf32>,
    return
  }
  func.func @transform_0(%arg0: i32) -> (i32, i32, i32) {
    %c0_i32 = arith.constant 0 : i32
    %c0_i32_0 = arith.constant 0 : i32
    %c0_i32_1 = arith.constant 0 : i32
    return %arg0, %c0_i32, %c0_i32_0 : i32, i32, i32
  }
  func.func @transform_1(%arg0: i32) -> (i32, i32) {
    %c0_i32 = arith.constant 0 : i32
    %c0_i32_0 = arith.constant 0 : i32
    %c0_i32_1 = arith.constant 0 : i32
    return %c0_i32, %c0_i32_0 : i32, i32
  }
  func.func @transform_2(%arg0: i32) -> (i32, i32) {
    %c0_i32 = arith.constant 0 : i32
    %c0_i32_0 = arith.constant 0 : i32
    %c0_i32_1 = arith.constant 0 : i32
    return %c0_i32, %c0_i32_0 : i32, i32
  }
  func.func @transform_3(%arg0: i32) -> (i32, i32) {
    %c0_i32 = arith.constant 0 : i32
    %c0_i32_0 = arith.constant 0 : i32
    %c0_i32_1 = arith.constant 0 : i32
    return %c0_i32, %c0_i32_0 : i32, i32
  }
  func.func @transform_4(%arg0: i32) -> (i32, i32, i32) {
    %c0_i32 = arith.constant 0 : i32
    %c0_i32_0 = arith.constant 0 : i32
    %c0_i32_1 = arith.constant 0 : i32
    return %arg0, %c0_i32, %c0_i32_0 : i32, i32, i32
  }
}

</mosaic_0001>

<bundles_post_ra>
// kernel: tpu_custom_call.1
= control target key start
LH: loop header
LB: loop body
LE: loop exit
PB: predicated region body
PF: predicated region fallthrough
CT: control target
= control target key end

     0   :  { %9 = vsyncpa [#allocation3], 0  ;;  %s6429_s0 = inlined_call_operand.hbm [shape: f32[2,8,128], index: 0, kind: input, shape index: {}]   ;;  %s6430_s1 = inlined_call_operand.hbm [shape: f32[128,2048], index: 1, kind: input, shape index: {}]   ;;  %s6431_s2 = inlined_call_operand.hbm [shape: f32[1024,128], index: 2, kind: input, shape index: {}]   ;;  %s6432_s3 = inlined_call_operand.vmem [shape: f32[1,128], index: 3, kind: input, shape index: {}]   ;;  %s6433_s4 = inlined_call_operand.hbm [shape: f32[2,8,128], index: 4, kind: output, shape index: {}]  }
   0x1   :  { %11 = vsyncpa [#allocation3 + $0x1], 0 }
   0x2   :  { %12 = vsyncpa [#allocation6], 0 }
   0x3   :  { %13 = vsyncpa [#allocation4], 0 }
   0x4   :  { %15 = vsyncpa [#allocation4 + $0x1], 0  ;;  %s5836_s15 = smov 0   ;;  %s5838_s16 = smov 0  }
   0x5   :  { %s5840_s17 = smov 0   ;;  %s5842_s18 = smov 0  }
   0x6 LB: > { %s5857_s19 = sadd.s32 4294967295, %s5798_s18   ;;  %s4403_s20 = sadd.s32 4294967294, %s5798_s18   ;;  %s5798_s18 = sphi %s5842_s18, %s6453_s18   ;;  %s5794_s17 = sphi %s5840_s17, %s6452_s17   ;;  %s5790_s16 = sphi %s5838_s16, %s6451_s16   ;;  %s5786_s15 = sphi %s5836_s15, %s6450_s15  }
   0x7   : > { %p41_p0 = scmp.ne.s32.totalorder %s5790_s16, %s5786_s15  ;;  %p6434_p1 = scmp.eq.s32.totalorder %s5857_s19, 0 }
   0x8   : > { %p134_p3 = scmp.eq.s32.totalorder %s4403_s20, 1  ;;  %p4404_p5 = scmp.ge.s32.totalorder %s5798_s18, 1 }
   0x9   : > { %p5866_p4 = por %p6434_p1, %p41_p0  ;;  %p141_p7 = scmp.lt.s32.totalorder %s5798_s18, 3 }
   0xa   : > { %p5871_p6 = por %p134_p3, %p41_p0  ;;  %s5800_s24 = smov [#allocation5]  }
   0xb   : > { %s6437_s21 = scalar_select %p5866_p4, 1, 0 }
   0xc   : > { %s6438_s22 = scalar_select %p5871_p6, 1, 0 }
   0xd   : > { %p5876_p8 = pnand %p4404_p5, %p141_p7  ;;  %s153_s25 = sshll.u32 %s5800_s24, 4  ;;  %s5880_s25 = int_to_ptr.vmem [resolvable:$true] %s153_s25 }
   0xe   : > { %s5801_s27 = smov [#allocation7]   ;;  %s5642_s5 = scalar_lea.hbm %s6430_s1, 32768 }
   0xf   : > { %p5544_p9 = pneg %p5876_p8  ;;  %s166_s28 = sshll.u32 %s5801_s27, 4  ;;  %s5891_s28 = int_to_ptr.vmem [resolvable:$true] %s166_s28 }
  0x10   : > { %p5643_p12 = scmp.ne.s32.totalorder %s6430_s1, %s5642_s5  ;;  %p5649_p5 = scmp.lt.u32.totalorder %s5642_s5, %s6430_s1 }
  0x11   : > { %p5887_p11 = pnand %p5544_p9, %p6434_p1 }
  0x13   : > { %p5644_p13 = pneg %p5887_p11 }
  0x15   : > { %p5645_p0 = pnand %p5644_p13, %p5643_p12 }
  0x17   : > { %p5646_p3 = pneg %p5645_p0 }
  0x19   : > { %p5651_p7 = pnand %p5649_p5, %p5646_p3 }
  0x1b   : > { %5654 = shalt.err (!%p5651_p7)
}
  0x1c   : > { %s5655_s10 = scalar_lea.vmem %s5880_s25, 32768  ;;  %p5663_p2 = scmp.lt.s32.totalorder %s5880_s25, %s5880_s25 }
  0x1d   : > { %p5656_p9 = scmp.ne.s32.totalorder %s5880_s25, %s5655_s10  ;;  %p5664_p12 = scmp.lt.s32.totalorder %s5655_s10, %s5655_s10 }
  0x1f   : > { %p5658_p10 = pnand %p5656_p9, %p5644_p13  ;;  %p5665_p0 = por %p5664_p12, %p5663_p2 }
  0x21   : > { %p5659_p1 = pneg %p5658_p10 }
  0x23   : > { %p5666_p6 = pnand %p5665_p0, %p5659_p1 }
  0x25   : > { %5669 = shalt.err (!%p5666_p6)
}
  0x26   : > { %s5802_s11 = smov 2048   ;;  %s5803_s12 = smov 128  }
  0x27   : > { %5547 = dma.hbm_to_vmem [thread:$0]  (!%p5887_p11), %s6430_s1, 32768, %s5880_s25, [#allocation6], %s5802_s11, %s5802_s11, %s5803_s12  }
  0x28   : > { %s5670_s27 = scalar_lea.hbm %s6431_s2, 16384 }
  0x29   : > { %p5671_p2 = scmp.ne.s32.totalorder %s6431_s2, %s5670_s27  ;;  %p5677_p10 = scmp.lt.u32.totalorder %s5670_s27, %s6431_s2 }
  0x2b   : > { %p5673_p1 = pnand %p5671_p2, %p5644_p13 }
  0x2d   : > { %p5674_p6 = pneg %p5673_p1 }
  0x2f   : > { %p5679_p3 = pnand %p5677_p10, %p5674_p6 }
  0x31   : > { %5682 = shalt.err (!%p5679_p3)
}
  0x32   : > { %s5683_s25 = scalar_lea.vmem %s5891_s28, 16384  ;;  %p5691_p12 = scmp.lt.s32.totalorder %s5891_s28, %s5891_s28 }
  0x33   : > { %p5684_p5 = scmp.ne.s32.totalorder %s5891_s28, %s5683_s25  ;;  %p5692_p0 = scmp.lt.s32.totalorder %s5683_s25, %s5683_s25 }
  0x35   : > { %p5686_p7 = pnand %p5684_p5, %p5644_p13  ;;  %p5693_p2 = por %p5692_p0, %p5691_p12 }
  0x37   : > { %p5687_p9 = pneg %p5686_p7 }
  0x39   : > { %p5694_p1 = pnand %p5693_p2, %p5687_p9 }
  0x3b   : > { %5697 = shalt.err (!%p5694_p1)
}
  0x3c   : > { %s5804_s7 = smov 8   ;;  %s5946_s10 = sadd.s32 1, %s5798_s18  }
  0x3d   : > { %5550 = dma.hbm_to_vmem [thread:$0]  (!%p5887_p11), %s6431_s2, 16384, %s5891_s28, [#allocation6], %s5803_s12, %s5803_s12, %s5804_s7  }
  0x3e   : > { %s25_s26 = ssub.s32 %s5798_s18, %s5946_s10  ;;  %s28_s11 = sadd.s32 1, %s5794_s17 }
  0x3f   : > { %p26_p13 = scmp.eq.s32.totalorder %s25_s26, 0  ;;  %p35_p6 = scmp.ne.s32.totalorder %s5794_s17, %s5790_s16 }
  0x40   : > { %p36_p10 = scmp.eq.s32.totalorder %s5798_s18, 0  ;;  %p5561_p3 = scmp.lt.s32.totalorder %s5798_s18, 2 }
  0x41   : > { %s5956_s13 = scalar_select %p26_p13, %s5794_s17, %s28_s11  }
  0x42   : > { %p37_p5 = por %p36_p10, %p35_p6  ;;  %p6441_p7 = scmp.eq.s32.totalorder %s5857_s19, 1 }
  0x43   : > { %s183_s20 = sand.u32 1, %s5794_s17   ;;  %s4409_s24 = sshll.u32 %s5798_s18, 7 }
  0x44   : > { %p5960_p9 = por %p6441_p7, %p35_p6  ;;  %s4408_s28 = sshll.u32 %s183_s20, 3 }
  0x45   : > { %s5969_s29 = scalar_lea.hbm %s6429_s0, %s4409_s24  ;;  %s187_s30 = scalar_lea.vmem [#allocation2], %s4408_s28 }
  0x46   : > { %s6442_s14 = scalar_select %p5960_p9, 1, 0 }
  0x47   : > { %s194_s5 = sshll.u32 %s187_s30, 4  ;;  %p5971_p11 = pnand %p5561_p3, %p37_p5  ;;  %s5975_s5 = int_to_ptr.vmem [resolvable:$true] %s194_s5 }
  0x48   : > { %s184_s25 = scalar_lea.sflag [#allocation3], %s183_s20  ;;  %s5698_s7 = scalar_lea.hbm %s5969_s29, 128 }
  0x49   : > { %p5699_p12 = scmp.ne.s32.totalorder %s5969_s29, %s5698_s7  ;;  %p5700_p0 = pneg %p5971_p11 }
  0x4a   : > { %s5703_s26 = scalar_lea.hbm %s6429_s0, 256  ;;  %p5704_p13 = scmp.lt.u32.totalorder %s5969_s29, %s6429_s0 }
  0x4b   : > { %p5701_p2 = pnand %p5700_p0, %p5699_p12  ;;  %p5705_p6 = scmp.lt.u32.totalorder %s5703_s26, %s5698_s7 }
  0x4c   : > { %p5707_p3 = scmp.lt.u32.totalorder %s5698_s7, %s5969_s29 }
  0x4d   : > { %p5702_p1 = pneg %p5701_p2  ;;  %p5706_p10 = por %p5705_p6, %p5704_p13 }
  0x4f   : > { %p5708_p5 = por %p5707_p3, %p5706_p10 }
  0x51   : > { %p5709_p7 = pnand %p5708_p5, %p5702_p1 }
  0x53   : > { %5712 = shalt.err (!%p5709_p7)
}
  0x54   : > { %s5713_s20 = scalar_lea.vmem %s5975_s5, 128  ;;  %s5805_s28 = smov [#allocation2]  }
  0x55   : > { %p5714_p12 = scmp.ne.s32.totalorder %s5975_s5, %s5713_s20  ;;  %s5718_s12 = sshll.u32 %s5805_s28, 4  ;;  %s5719_s12 = int_to_ptr.vmem [resolvable:$false] %s5718_s12 }
  0x56   : > { %s5720_s27 = scalar_lea.vmem %s5719_s12, 256  ;;  %p5721_p4 = scmp.lt.s32.totalorder %s5975_s5, %s5719_s12 }
  0x57   : > { %p5716_p2 = pnand %p5714_p12, %p5700_p0  ;;  %p5722_p13 = scmp.lt.s32.totalorder %s5720_s27, %s5713_s20 }
  0x59   : > { %p5717_p9 = pneg %p5716_p2  ;;  %p5723_p6 = por %p5722_p13, %p5721_p4 }
  0x5b   : > { %p5724_p10 = pnand %p5723_p6, %p5717_p9 }
  0x5d   : > { %5727 = shalt.err (!%p5724_p10)
}
  0x5e   : > { %5554 = dma.hbm_to_vmem [thread:$0]  (!%p5971_p11), %s5969_s29, 128, %s5975_s5, %s184_s25  }
  0x5f   : > { %203 = sbr.rel (%p5876_p8) target bundleno = 6378 (0x18ea), region = 36  ;;  %s6005_s30 = sand.u32 (!%p5876_p8), 1, %s5790_s16  }
  0x60   : > { %s4411_s7 = sshll.u32 (!%p5876_p8), %s6005_s30, 3  ;;  %s206_s8 = scalar_lea.sflag (!%p5876_p8), [#allocation3], %s6005_s30 }
  0x61   : > { %s6011_s9 = scalar_lea.vmem (!%p5876_p8), [#allocation2], %s4411_s7  ;;  %p6444_p4 = scmp.ne.s32.totalorder (!%p5876_p8), %s6437_s21, 0 }
  0x66   : > { %5773 = dma.done.wait (%p6444_p4), %s206_s8, 128  }
  0x67   : > { %5775 = vsyncadd (%p6444_p4), %s206_s8, 4294967168  ;;  %p6445_p9 = scmp.eq.s32.totalorder %s5857_s19, 0 }
  0x69   : > { %5777 = dma.done.wait (%p6445_p9), [#allocation6], 49152   ;;  %p6446_p8 = pmov %p6445_p9 }
  0x6a   : > { %v5806_v0 = vmov 0.0   ;;  %v244_v1 = vld [vmem:[#allocation5 + $0x8] sm:$0xff]  ;;  %v243_v3 = vld [vmem:[#allocation5] sm:$0xff]  ;;  %v6024_v56 = vld [vmem:[%s6011_s9] sm:$0xff]  ;;  %vm5807_vm0 = vmmov 0   ;;  %vm1089_vm1 = vcmask 523264  }
  0x6b   : > { %5779 = vsyncadd (%p6446_p8), [#allocation6], 4294918144  ;;  %563 = vmatprep.mubr.f32.mxu0 %v5806_v0  ;;  %634 = vmatprep.mubr.f32.mxu1 %v5806_v0  ;;  %v260_v2 = vld [vmem:[#allocation5 + $0x88] sm:$0xff]  ;;  %v259_v5 = vld [vmem:[#allocation5 + $0x80] sm:$0xff]  ;;  %s5808_s21 = smov 64   ;;  %vm1079_vm2 = vcmask 64512  }
  0x6c   : > { %v5084_v4 = vpack.c.bf16 %v260_v2, %v244_v1  ;;  %v276_v6 = vld [vmem:[#allocation5 + $0x108] sm:$0xff]  ;;  %v5086_v8 = vpack.c.bf16 %v259_v5, %v243_v3  ;;  %v275_v10 = vld [vmem:[#allocation5 + $0x100] sm:$0xff]  ;;  %s4465_s5 = sshll.u32 %s5857_s19, 7  ;;  %s241_s6 = scalar_lea.vmem [#allocation8], %s4411_s7 }
  0x6d   : > { %v292_v7 = vld [vmem:[#allocation5 + $0x188] sm:$0xff]  ;;  %v291_v11 = vld [vmem:[#allocation5 + $0x180] sm:$0xff]  ;;  %s4314_s25 = sshll.u32 %s241_s6, 4  ;;  %s6385_s24 = scalar_lea.hbm %s6433_s4, %s4465_s5  ;;  %s6387_s25 = int_to_ptr.vmem [resolvable:$true] %s4314_s25 }
  0x6e   : > { %v5088_v9 = vpack.c.bf16 %v292_v7, %v276_v6  ;;  %v308_v12 = vld [vmem:[#allocation5 + $0x208] sm:$0xff]  ;;  %5085 = vmatprep.subr.bf16.mxu0 %v5084_v4  ;;  %v5090_v14 = vpack.c.bf16 %v291_v11, %v275_v10  ;;  %v307_v16 = vld [vmem:[#allocation5 + $0x200] sm:$0xff]  ;;  %s4301_s20 = scalar_lea.sflag [#allocation4], %s6005_s30  ;;  %s5728_s28 = scalar_lea.vmem %s6387_s25, 128 }
  0x6f   : > { %v324_v13 = vld [vmem:[#allocation5 + $0x288] sm:$0xff]  ;;  %5087 = vmatpush1.bf16.msra.mxu0 %v5086_v8  ;;  %v323_v17 = vld [vmem:[#allocation5 + $0x280] sm:$0xff]  ;;  %p5729_p11 = scmp.ne.s32.totalorder %s6387_s25, %s5728_s28  ;;  %p6447_p0 = scmp.ne.s32.totalorder %s6442_s14, 0 }
  0x70   : > { %5089 = vmatprep.subr.bf16.mxu0 %v5088_v9  ;;  %v5092_v15 = vpack.c.bf16 %v324_v13, %v308_v12  ;;  %v340_v18 = vld [vmem:[#allocation5 + $0x308] sm:$0xff]  ;;  %v5094_v20 = vpack.c.bf16 %v323_v17, %v307_v16  ;;  %v339_v22 = vld [vmem:[#allocation5 + $0x300] sm:$0xff]  ;;  %s5810_s19 = smov [#allocation8]  }
  0x71   : > { %v356_v19 = vld [vmem:[#allocation5 + $0x388] sm:$0xff]  ;;  %v355_v23 = vld [vmem:[#allocation5 + $0x380] sm:$0xff]  ;;  %p5730_p1 = pnand %p5729_p11, %p6447_p0  ;;  %s5732_s12 = sshll.u32 %s5810_s19, 4  ;;  %s5733_s12 = int_to_ptr.vmem [resolvable:$false] %s5732_s12 }
  0x72   : > { %v5096_v21 = vpack.c.bf16 %v356_v19, %v340_v18  ;;  %v372_v24 = vld [vmem:[#allocation5 + $0x408] sm:$0xff]  ;;  %v5098_v26 = vpack.c.bf16 %v355_v23, %v339_v22  ;;  %v371_v28 = vld [vmem:[#allocation5 + $0x400] sm:$0xff]  ;;  %s5734_s27 = scalar_lea.vmem %s5733_s12, 256  ;;  %p5735_p5 = scmp.lt.s32.totalorder %s6387_s25, %s5733_s12 }
  0x73   : > { %5091 = vmatpush1.bf16.msra.mxu0 %v5090_v14  ;;  %v388_v25 = vld [vmem:[#allocation5 + $0x488] sm:$0xff]  ;;  %v387_v29 = vld [vmem:[#allocation5 + $0x480] sm:$0xff]  ;;  %p5731_p3 = pneg %p5730_p1  ;;  %p5736_p7 = scmp.lt.s32.totalorder %s5734_s27, %s5728_s28 }
  0x74   : > { %5093 = vmatprep.subr.bf16.mxu0 %v5092_v15  ;;  %v5100_v27 = vpack.c.bf16 %v388_v25, %v372_v24  ;;  %v404_v30 = vld [vmem:[#allocation5 + $0x508] sm:$0xff]  ;;  %v5102_v32 = vpack.c.bf16 %v387_v29, %v371_v28  ;;  %v403_v34 = vld [vmem:[#allocation5 + $0x500] sm:$0xff] }
  0x75   : > { %v420_v31 = vld [vmem:[#allocation5 + $0x588] sm:$0xff]  ;;  %v419_v35 = vld [vmem:[#allocation5 + $0x580] sm:$0xff]  ;;  %p5737_p12 = por %p5736_p7, %p5735_p5 }
  0x76   : > { %v5104_v33 = vpack.c.bf16 %v420_v31, %v404_v30  ;;  %v436_v36 = vld [vmem:[#allocation5 + $0x608] sm:$0xff]  ;;  %v5106_v38 = vpack.c.bf16 %v419_v35, %v403_v34  ;;  %v435_v40 = vld [vmem:[#allocation5 + $0x600] sm:$0xff] }
  0x77   : > { %5095 = vmatpush1.bf16.msra.mxu0 %v5094_v20  ;;  %v452_v37 = vld [vmem:[#allocation5 + $0x688] sm:$0xff]  ;;  %v451_v41 = vld [vmem:[#allocation5 + $0x680] sm:$0xff]  ;;  %p5738_p2 = pnand %p5737_p12, %p5731_p3 }
  0x78   : > { %5097 = vmatprep.subr.bf16.mxu0 %v5096_v21  ;;  %v5108_v39 = vpack.c.bf16 %v452_v37, %v436_v36  ;;  %v468_v42 = vld [vmem:[#allocation5 + $0x708] sm:$0xff]  ;;  %v5110_v44 = vpack.c.bf16 %v451_v41, %v435_v40  ;;  %v467_v46 = vld [vmem:[#allocation5 + $0x700] sm:$0xff] }
  0x79   : > { %v484_v43 = vld [vmem:[#allocation5 + $0x788] sm:$0xff]  ;;  %v483_v47 = vld [vmem:[#allocation5 + $0x780] sm:$0xff] }
  0x7a   : > { %v5112_v45 = vpack.c.bf16 %v484_v43, %v468_v42  ;;  %v248_v48 = vld [vmem:[#allocation5 + $0x28] sm:$0xff]  ;;  %v5114_v50 = vpack.c.bf16 %v483_v47, %v467_v46  ;;  %v247_v52 = vld [vmem:[#allocation5 + $0x20] sm:$0xff] }
  0x7b   : > { %5099 = vmatpush1.bf16.msra.mxu0 %v5098_v26  ;;  %v264_v49 = vld [vmem:[#allocation5 + $0xa8] sm:$0xff]  ;;  %v263_v53 = vld [vmem:[#allocation5 + $0xa0] sm:$0xff] }
  0x7c   : > { %5101 = vmatprep.subr.bf16.mxu0 %v5100_v27  ;;  %v5148_v51 = vpack.c.bf16 %v264_v49, %v248_v48  ;;  %v280_v54 = vld [vmem:[#allocation5 + $0x128] sm:$0xff]  ;;  %v5150_v57 = vpack.c.bf16 %v263_v53, %v247_v52  ;;  %v279_v59 = vld [vmem:[#allocation5 + $0x120] sm:$0xff] }
  0x7d   : > { %v296_v55 = vld [vmem:[#allocation5 + $0x1a8] sm:$0xff]  ;;  %v295_v60 = vld [vmem:[#allocation5 + $0x1a0] sm:$0xff] }
  0x7e   : > { %v5152_v58 = vpack.c.bf16 %v296_v55, %v280_v54  ;;  %v312_v61 = vld [vmem:[#allocation5 + $0x228] sm:$0xff]  ;;  %v5154_v63 = vpack.c.bf16 %v295_v60, %v279_v59  ;;  %v311_v2 = vld [vmem:[#allocation5 + $0x220] sm:$0xff] }
  0x7f   : > { %5103 = vmatpush1.bf16.msra.mxu0 %v5102_v32  ;;  %v328_v62 = vld [vmem:[#allocation5 + $0x2a8] sm:$0xff]  ;;  %v327_v3 = vld [vmem:[#allocation5 + $0x2a0] sm:$0xff] }
  0x80   : > { %5105 = vmatprep.subr.bf16.mxu0 %v5104_v33  ;;  %v5156_v1 = vpack.c.bf16 %v328_v62, %v312_v61  ;;  %v344_v4 = vld [vmem:[#allocation5 + $0x328] sm:$0xff]  ;;  %v5158_v6 = vpack.c.bf16 %v327_v3, %v311_v2  ;;  %v343_v8 = vld [vmem:[#allocation5 + $0x320] sm:$0xff] }
  0x81   : > { %v360_v5 = vld [vmem:[#allocation5 + $0x3a8] sm:$0xff]  ;;  %v359_v9 = vld [vmem:[#allocation5 + $0x3a0] sm:$0xff] }
  0x82   : > { %v5160_v7 = vpack.c.bf16 %v360_v5, %v344_v4  ;;  %v376_v10 = vld [vmem:[#allocation5 + $0x428] sm:$0xff]  ;;  %v5162_v12 = vpack.c.bf16 %v359_v9, %v343_v8  ;;  %v375_v14 = vld [vmem:[#allocation5 + $0x420] sm:$0xff] }
  0x83   : > { %5107 = vmatpush1.bf16.msra.mxu0 %v5106_v38  ;;  %v392_v11 = vld [vmem:[#allocation5 + $0x4a8] sm:$0xff]  ;;  %v391_v15 = vld [vmem:[#allocation5 + $0x4a0] sm:$0xff] }
  0x84   : > { %5109 = vmatprep.subr.bf16.mxu0 %v5108_v39  ;;  %v5164_v13 = vpack.c.bf16 %v392_v11, %v376_v10  ;;  %v408_v16 = vld [vmem:[#allocation5 + $0x528] sm:$0xff]  ;;  %v5166_v18 = vpack.c.bf16 %v391_v15, %v375_v14  ;;  %v407_v20 = vld [vmem:[#allocation5 + $0x520] sm:$0xff] }
  0x85   : > { %v424_v17 = vld [vmem:[#allocation5 + $0x5a8] sm:$0xff]  ;;  %v423_v21 = vld [vmem:[#allocation5 + $0x5a0] sm:$0xff] }
  0x86   : > { %v5168_v19 = vpack.c.bf16 %v424_v17, %v408_v16  ;;  %v440_v22 = vld [vmem:[#allocation5 + $0x628] sm:$0xff]  ;;  %v5170_v24 = vpack.c.bf16 %v423_v21, %v407_v20  ;;  %v439_v26 = vld [vmem:[#allocation5 + $0x620] sm:$0xff] }
  0x87   : > { %5111 = vmatpush1.bf16.msra.mxu0 %v5110_v44  ;;  %v456_v23 = vld [vmem:[#allocation5 + $0x6a8] sm:$0xff]  ;;  %v455_v27 = vld [vmem:[#allocation5 + $0x6a0] sm:$0xff] }
  0x88   : > { %5113 = vmatprep.subr.bf16.mxu0 %v5112_v45  ;;  %v5172_v25 = vpack.c.bf16 %v456_v23, %v440_v22  ;;  %v472_v28 = vld [vmem:[#allocation5 + $0x728] sm:$0xff]  ;;  %v5174_v30 = vpack.c.bf16 %v455_v27, %v439_v26  ;;  %v471_v32 = vld [vmem:[#allocation5 + $0x720] sm:$0xff] }
  0x89   : > { %v488_v29 = vld [vmem:[#allocation5 + $0x7a8] sm:$0xff]  ;;  %v487_v33 = vld [vmem:[#allocation5 + $0x7a0] sm:$0xff] }
  0x8a   : > { %v5176_v31 = vpack.c.bf16 %v488_v29, %v472_v28  ;;  %v252_v34 = vld [vmem:[#allocation5 + $0x48] sm:$0xff]  ;;  %v5178_v36 = vpack.c.bf16 %v487_v33, %v471_v32  ;;  %v251_v38 = vld [vmem:[#allocation5 + $0x40] sm:$0xff] }
  0x8b   : > { %5115 = vmatpush1.bf16.msra.mxu0 %v5114_v50  ;;  %v268_v35 = vld [vmem:[#allocation5 + $0xc8] sm:$0xff]  ;;  %v267_v39 = vld [vmem:[#allocation5 + $0xc0] sm:$0xff] }
  0x8c   : > { %5149 = vmatprep.subr.bf16.mxu0 %v5148_v51  ;;  %v5212_v37 = vpack.c.bf16 %v268_v35, %v252_v34  ;;  %v284_v40 = vld [vmem:[#allocation5 + $0x148] sm:$0xff]  ;;  %v5214_v42 = vpack.c.bf16 %v267_v39, %v251_v38  ;;  %v283_v44 = vld [vmem:[#allocation5 + $0x140] sm:$0xff] }
  0x8d   : > { %v300_v41 = vld [vmem:[#allocation5 + $0x1c8] sm:$0xff]  ;;  %v299_v45 = vld [vmem:[#allocation5 + $0x1c0] sm:$0xff] }
  0x8e   : > { %564 = vmatmul.mubr.f32.vlgmr.msra.gmra.mrb[0].mxu0 %v6024_v56  ;;  %v5216_v43 = vpack.c.bf16 %v300_v41, %v284_v40  ;;  %v316_v46 = vld [vmem:[#allocation5 + $0x248] sm:$0xff]  ;;  %v5218_v48 = vpack.c.bf16 %v299_v45, %v283_v44  ;;  %v315_v50 = vld [vmem:[#allocation5 + $0x240] sm:$0xff] }
  0x8f   : > { %5151 = vmatpush1.bf16.msra.mxu0 %v5150_v57  ;;  %705 = vmatprep.mubr.f32.mxu0 %v5806_v0  ;;  %v332_v47 = vld [vmem:[#allocation5 + $0x2c8] sm:$0xff]  ;;  %v331_v51 = vld [vmem:[#allocation5 + $0x2c0] sm:$0xff] }
  0x90   : > { %5153 = vmatprep.subr.bf16.mxu0 %v5152_v58  ;;  %v5220_v49 = vpack.c.bf16 %v332_v47, %v316_v46  ;;  %v348_v52 = vld [vmem:[#allocation5 + $0x348] sm:$0xff]  ;;  %v5222_v54 = vpack.c.bf16 %v331_v51, %v315_v50  ;;  %v347_v57 = vld [vmem:[#allocation5 + $0x340] sm:$0xff] }
  0x91   : > { %v364_v53 = vld [vmem:[#allocation5 + $0x3c8] sm:$0xff]  ;;  %v363_v58 = vld [vmem:[#allocation5 + $0x3c0] sm:$0xff] }
  0x92   : > { %v5224_v55 = vpack.c.bf16 %v364_v53, %v348_v52  ;;  %v380_v59 = vld [vmem:[#allocation5 + $0x448] sm:$0xff]  ;;  %v5226_v61 = vpack.c.bf16 %v363_v58, %v347_v57  ;;  %v351_v41 = vld [vmem:[#allocation5 + $0x360] sm:$0xff] }
  0x93   : > { %5155 = vmatpush1.bf16.msra.mxu0 %v5154_v63  ;;  %v396_v60 = vld [vmem:[#allocation5 + $0x4c8] sm:$0xff]  ;;  %v379_v63 = vld [vmem:[#allocation5 + $0x440] sm:$0xff] }
  0x94   : > { %5157 = vmatprep.subr.bf16.mxu0 %v5156_v1  ;;  %v5228_v62 = vpack.c.bf16 %v396_v60, %v380_v59  ;;  %v395_v1 = vld [vmem:[#allocation5 + $0x4c0] sm:$0xff]  ;;  %v412_v2 = vld [vmem:[#allocation5 + $0x548] sm:$0xff] }
  0x95   : > { %v428_v3 = vld [vmem:[#allocation5 + $0x5c8] sm:$0xff]  ;;  %v5230_v4 = vpack.c.bf16 %v395_v1, %v379_v63 }
  0x96   : > { %v5232_v5 = vpack.c.bf16 %v428_v3, %v412_v2  ;;  %v444_v8 = vld [vmem:[#allocation5 + $0x648] sm:$0xff] }
  0x97   : > { %5159 = vmatpush1.bf16.msra.mxu0 %v5158_v6  ;;  %v411_v6 = vld [vmem:[#allocation5 + $0x540] sm:$0xff]  ;;  %v460_v9 = vld [vmem:[#allocation5 + $0x6c8] sm:$0xff] }
  0x98   : > { %5161 = vmatprep.subr.bf16.mxu0 %v5160_v7  ;;  %v427_v7 = vld [vmem:[#allocation5 + $0x5c0] sm:$0xff]  ;;  %v5236_v11 = vpack.c.bf16 %v460_v9, %v444_v8  ;;  %v476_v14 = vld [vmem:[#allocation5 + $0x748] sm:$0xff]  ;;  %v262_v8 = vld [vmem:[#allocation5 + $0x98] sm:$0xff] }
  0x99   : > { %v5234_v10 = vpack.c.bf16 %v427_v7, %v411_v6  ;;  %v492_v15 = vld [vmem:[#allocation5 + $0x7c8] sm:$0xff]  ;;  %v246_v7 = vld [vmem:[#allocation5 + $0x18] sm:$0xff]  ;;  %v245_v9 = vld [vmem:[#allocation5 + $0x10] sm:$0xff] }
  0x9a   : > { %v5240_v17 = vpack.c.bf16 %v492_v15, %v476_v14  ;;  %v256_v20 = vld [vmem:[#allocation5 + $0x68] sm:$0xff] }
  0x9b   : > { %5163 = vmatpush1.bf16.msra.mxu0 %v5162_v12  ;;  %v443_v12 = vld [vmem:[#allocation5 + $0x640] sm:$0xff]  ;;  %v272_v21 = vld [vmem:[#allocation5 + $0xe8] sm:$0xff] }
  0x9c   : > { %5165 = vmatprep.subr.bf16.mxu0 %v5164_v13  ;;  %v459_v13 = vld [vmem:[#allocation5 + $0x6c0] sm:$0xff]  ;;  %v5276_v23 = vpack.c.bf16 %v272_v21, %v256_v20  ;;  %v288_v26 = vld [vmem:[#allocation5 + $0x168] sm:$0xff] }
  0x9d   : > { %v5238_v16 = vpack.c.bf16 %v459_v13, %v443_v12  ;;  %v304_v27 = vld [vmem:[#allocation5 + $0x1e8] sm:$0xff]  ;;  %v278_v12 = vld [vmem:[#allocation5 + $0x118] sm:$0xff] }
  0x9e   : > { %v5280_v29 = vpack.c.bf16 %v304_v27, %v288_v26  ;;  %v320_v33 = vld [vmem:[#allocation5 + $0x268] sm:$0xff]  ;;  %v294_v13 = vld [vmem:[#allocation5 + $0x198] sm:$0xff] }
  0x9f   : > { %5167 = vmatpush1.bf16.msra.mxu0 %v5166_v18  ;;  %v475_v18 = vld [vmem:[#allocation5 + $0x740] sm:$0xff]  ;;  %v336_v34 = vld [vmem:[#allocation5 + $0x2e8] sm:$0xff]  ;;  %v5120_v15 = vpack.c.bf16 %v294_v13, %v278_v12 }
  0xa0   : > { %5169 = vmatprep.subr.bf16.mxu0 %v5168_v19  ;;  %v491_v19 = vld [vmem:[#allocation5 + $0x7c0] sm:$0xff]  ;;  %v5284_v35 = vpack.c.bf16 %v336_v34, %v320_v33  ;;  %v352_v38 = vld [vmem:[#allocation5 + $0x368] sm:$0xff]  ;;  %v373_v34 = vld [vmem:[#allocation5 + $0x410] sm:$0xff] }
  0xa1   : > { %v5242_v22 = vpack.c.bf16 %v491_v19, %v475_v18  ;;  %v368_v40 = vld [vmem:[#allocation5 + $0x3e8] sm:$0xff]  ;;  %v310_v18 = vld [vmem:[#allocation5 + $0x218] sm:$0xff] }
  0xa2   : > { %v384_v44 = vld [vmem:[#allocation5 + $0x468] sm:$0xff]  ;;  %v326_v19 = vld [vmem:[#allocation5 + $0x298] sm:$0xff] }
  0xa3   : > { %5171 = vmatpush1.bf16.msra.mxu0 %v5170_v24  ;;  %v255_v24 = vld [vmem:[#allocation5 + $0x60] sm:$0xff]  ;;  %v400_v45 = vld [vmem:[#allocation5 + $0x4e8] sm:$0xff]  ;;  %v5124_v21 = vpack.c.bf16 %v326_v19, %v310_v18 }
  0xa4   : > { %5173 = vmatprep.subr.bf16.mxu0 %v5172_v25  ;;  %v271_v25 = vld [vmem:[#allocation5 + $0xe0] sm:$0xff]  ;;  %v5292_v47 = vpack.c.bf16 %v400_v45, %v384_v44  ;;  %v416_v50 = vld [vmem:[#allocation5 + $0x568] sm:$0xff] }
  0xa5   : > { %v5278_v28 = vpack.c.bf16 %v271_v25, %v255_v24  ;;  %v432_v51 = vld [vmem:[#allocation5 + $0x5e8] sm:$0xff]  ;;  %v342_v24 = vld [vmem:[#allocation5 + $0x318] sm:$0xff] }
  0xa6   : > { %v5296_v53 = vpack.c.bf16 %v432_v51, %v416_v50  ;;  %v448_v57 = vld [vmem:[#allocation5 + $0x668] sm:$0xff]  ;;  %v358_v25 = vld [vmem:[#allocation5 + $0x398] sm:$0xff] }
  0xa7   : > { %5175 = vmatpush1.bf16.msra.mxu0 %v5174_v30  ;;  %v287_v30 = vld [vmem:[#allocation5 + $0x160] sm:$0xff]  ;;  %v464_v58 = vld [vmem:[#allocation5 + $0x6e8] sm:$0xff]  ;;  %v5128_v27 = vpack.c.bf16 %v358_v25, %v342_v24 }
  0xa8   : > { %5177 = vmatprep.subr.bf16.mxu0 %v5176_v31  ;;  %v303_v31 = vld [vmem:[#allocation5 + $0x1e0] sm:$0xff]  ;;  %v5300_v60 = vpack.c.bf16 %v464_v58, %v448_v57  ;;  %v480_v63 = vld [vmem:[#allocation5 + $0x768] sm:$0xff] }
  0xa9   : > { %v5282_v32 = vpack.c.bf16 %v303_v31, %v287_v30  ;;  %v496_v1 = vld [vmem:[#allocation5 + $0x7e8] sm:$0xff]  ;;  %v374_v30 = vld [vmem:[#allocation5 + $0x418] sm:$0xff] }
  0xaa   : > { %v5304_v3 = vpack.c.bf16 %v496_v1, %v480_v63  ;;  %v390_v31 = vld [vmem:[#allocation5 + $0x498] sm:$0xff] }
  0xab   : > { %5179 = vmatpush1.bf16.msra.mxu0 %v5178_v36  ;;  %v319_v36 = vld [vmem:[#allocation5 + $0x260] sm:$0xff]  ;;  %v5132_v33 = vpack.c.bf16 %v390_v31, %v374_v30 }
  0xac   : > { %5213 = vmatprep.subr.bf16.mxu0 %v5212_v37  ;;  %v335_v37 = vld [vmem:[#allocation5 + $0x2e0] sm:$0xff] }
  0xad   : > { %v5286_v39 = vpack.c.bf16 %v335_v37, %v319_v36  ;;  %v406_v36 = vld [vmem:[#allocation5 + $0x518] sm:$0xff] }
  0xae   : > { %706 = vmatmul.mubr.f32.vlgmr.msra.gmra.mrb[2].mxu0 %v6024_v56  ;;  %v422_v37 = vld [vmem:[#allocation5 + $0x598] sm:$0xff] }
  0xaf   : > { %5215 = vmatpush1.bf16.msra.mxu0 %v5214_v42  ;;  %847 = vmatprep.mubr.f32.mxu0 %v5806_v0  ;;  %v367_v42 = vld [vmem:[#allocation5 + $0x3e0] sm:$0xff] }
  0xb0   : > { %5217 = vmatprep.subr.bf16.mxu0 %v5216_v43  ;;  %v5288_v43 = vpack.c.bf16 %v368_v40, %v352_v38  ;;  %v5290_v46 = vpack.c.bf16 %v367_v42, %v351_v41  ;;  %v405_v40 = vld [vmem:[#allocation5 + $0x510] sm:$0xff]  ;;  %v438_v42 = vld [vmem:[#allocation5 + $0x618] sm:$0xff] }
  0xb1   : > { %v421_v41 = vld [vmem:[#allocation5 + $0x590] sm:$0xff] }
  0xb2   : > { %v5138_v44 = vpack.c.bf16 %v421_v41, %v405_v40  ;;  %v254_v40 = vld [vmem:[#allocation5 + $0x58] sm:$0xff] }
  0xb3   : > { %5219 = vmatpush1.bf16.msra.mxu0 %v5218_v48  ;;  %v383_v48 = vld [vmem:[#allocation5 + $0x460] sm:$0xff]  ;;  %v270_v41 = vld [vmem:[#allocation5 + $0xd8] sm:$0xff] }
  0xb4   : > { %5221 = vmatprep.subr.bf16.mxu0 %v5220_v49  ;;  %v399_v49 = vld [vmem:[#allocation5 + $0x4e0] sm:$0xff] }
  0xb5   : > { %v5294_v52 = vpack.c.bf16 %v399_v49, %v383_v48  ;;  %v470_v48 = vld [vmem:[#allocation5 + $0x718] sm:$0xff] }
  0xb6   : > { %v486_v49 = vld [vmem:[#allocation5 + $0x798] sm:$0xff] }
  0xb7   : > { %5223 = vmatpush1.bf16.msra.mxu0 %v5222_v54  ;;  %v415_v54 = vld [vmem:[#allocation5 + $0x560] sm:$0xff]  ;;  %v5144_v51 = vpack.c.bf16 %v486_v49, %v470_v48 }
  0xb8   : > { %5225 = vmatprep.subr.bf16.mxu0 %v5224_v55  ;;  %v431_v55 = vld [vmem:[#allocation5 + $0x5e0] sm:$0xff] }
  0xb9   : > { %v5298_v59 = vpack.c.bf16 %v431_v55, %v415_v54  ;;  %v250_v54 = vld [vmem:[#allocation5 + $0x38] sm:$0xff] }
  0xba   : > { %v266_v55 = vld [vmem:[#allocation5 + $0xb8] sm:$0xff] }
  0xbb   : > { %5227 = vmatpush1.bf16.msra.mxu0 %v5226_v61  ;;  %v447_v61 = vld [vmem:[#allocation5 + $0x660] sm:$0xff]  ;;  %v5180_v58 = vpack.c.bf16 %v266_v55, %v250_v54  ;;  %v318_v55 = vld [vmem:[#allocation5 + $0x258] sm:$0xff] }
  0xbc   : > { %5229 = vmatprep.subr.bf16.mxu0 %v5228_v62  ;;  %v463_v62 = vld [vmem:[#allocation5 + $0x6e0] sm:$0xff] }
  0xbd   : > { %v5302_v2 = vpack.c.bf16 %v463_v62, %v447_v61  ;;  %v282_v61 = vld [vmem:[#allocation5 + $0x138] sm:$0xff] }
  0xbe   : > { %v298_v62 = vld [vmem:[#allocation5 + $0x1b8] sm:$0xff] }
  0xbf   : > { %5231 = vmatpush1.bf16.msra.mxu0 %v5230_v4  ;;  %v479_v4 = vld [vmem:[#allocation5 + $0x760] sm:$0xff]  ;;  %v5184_v1 = vpack.c.bf16 %v298_v62, %v282_v61  ;;  %v350_v62 = vld [vmem:[#allocation5 + $0x358] sm:$0xff] }
  0xc0   : > { %5233 = vmatprep.subr.bf16.mxu0 %v5232_v5  ;;  %v495_v5 = vld [vmem:[#allocation5 + $0x7e0] sm:$0xff] }
  0xc1   : > { %v5306_v6 = vpack.c.bf16 %v495_v5, %v479_v4  ;;  %v314_v4 = vld [vmem:[#allocation5 + $0x238] sm:$0xff] }
  0xc2   : > { %v330_v5 = vld [vmem:[#allocation5 + $0x2b8] sm:$0xff] }
  0xc3   : > { %5235 = vmatpush1.bf16.msra.mxu0 %v5234_v10  ;;  %v5116_v10 = vpack.c.bf16 %v262_v8, %v246_v7  ;;  %v5188_v7 = vpack.c.bf16 %v330_v5, %v314_v4  ;;  %v313_v8 = vld [vmem:[#allocation5 + $0x230] sm:$0xff]  ;;  %v382_v4 = vld [vmem:[#allocation5 + $0x458] sm:$0xff] }
  0xc4   : > { %5237 = vmatprep.subr.bf16.mxu0 %v5236_v11  ;;  %v261_v11 = vld [vmem:[#allocation5 + $0x90] sm:$0xff]  ;;  %v398_v5 = vld [vmem:[#allocation5 + $0x4d8] sm:$0xff] }
  0xc5   : > { %v5118_v14 = vpack.c.bf16 %v261_v11, %v245_v9  ;;  %5117 = vmatprep.subr.bf16.mxu1 %v5116_v10  ;;  %v329_v9 = vld [vmem:[#allocation5 + $0x2b0] sm:$0xff]  ;;  %v346_v10 = vld [vmem:[#allocation5 + $0x338] sm:$0xff] }
  0xc6   : > { %v362_v11 = vld [vmem:[#allocation5 + $0x3b8] sm:$0xff]  ;;  %v5190_v12 = vpack.c.bf16 %v329_v9, %v313_v8  ;;  %v381_v8 = vld [vmem:[#allocation5 + $0x450] sm:$0xff] }
  0xc7   : > { %5239 = vmatpush1.bf16.msra.mxu0 %v5238_v16  ;;  %v277_v16 = vld [vmem:[#allocation5 + $0x110] sm:$0xff]  ;;  %5119 = vmatpush1.bf16.msra.mxu1 %v5118_v14  ;;  %v5192_v13 = vpack.c.bf16 %v362_v11, %v346_v10  ;;  %v414_v10 = vld [vmem:[#allocation5 + $0x558] sm:$0xff] }
  0xc8   : > { %5241 = vmatprep.subr.bf16.mxu0 %v5240_v17  ;;  %v293_v17 = vld [vmem:[#allocation5 + $0x190] sm:$0xff]  ;;  %5121 = vmatprep.subr.bf16.mxu1 %v5120_v15  ;;  %v430_v11 = vld [vmem:[#allocation5 + $0x5d8] sm:$0xff] }
  0xc9   : > { %v5122_v20 = vpack.c.bf16 %v293_v17, %v277_v16  ;;  %v345_v14 = vld [vmem:[#allocation5 + $0x330] sm:$0xff]  ;;  %v378_v16 = vld [vmem:[#allocation5 + $0x438] sm:$0xff] }
  0xca   : > { %v361_v15 = vld [vmem:[#allocation5 + $0x3b0] sm:$0xff]  ;;  %v394_v17 = vld [vmem:[#allocation5 + $0x4b8] sm:$0xff] }
  0xcb   : > { %5243 = vmatpush1.bf16.msra.mxu0 %v5242_v22  ;;  %v309_v22 = vld [vmem:[#allocation5 + $0x210] sm:$0xff]  ;;  %5123 = vmatpush1.bf16.msra.mxu1 %v5122_v20  ;;  %v5194_v18 = vpack.c.bf16 %v361_v15, %v345_v14  ;;  %v5196_v19 = vpack.c.bf16 %v394_v17, %v378_v16  ;;  %v5264_v15 = vpack.c.bf16 %v430_v11, %v414_v10  ;;  %v446_v16 = vld [vmem:[#allocation5 + $0x658] sm:$0xff] }
  0xcc   : > { %5277 = vmatprep.subr.bf16.mxu0 %v5276_v23  ;;  %v325_v23 = vld [vmem:[#allocation5 + $0x290] sm:$0xff]  ;;  %5125 = vmatprep.subr.bf16.mxu1 %v5124_v21  ;;  %v462_v17 = vld [vmem:[#allocation5 + $0x6d8] sm:$0xff] }
  0xcd   : > { %v5126_v26 = vpack.c.bf16 %v325_v23, %v309_v22  ;;  %v377_v20 = vld [vmem:[#allocation5 + $0x430] sm:$0xff]  ;;  %v410_v22 = vld [vmem:[#allocation5 + $0x538] sm:$0xff] }
  0xce   : > { %848 = vmatmul.mubr.f32.vlgmr.msra.gmra.mrb[4].mxu0 %v6024_v56  ;;  %v393_v21 = vld [vmem:[#allocation5 + $0x4b0] sm:$0xff]  ;;  %v426_v23 = vld [vmem:[#allocation5 + $0x5b8] sm:$0xff] }
  0xcf   : > { %5279 = vmatpush1.bf16.msra.mxu0 %v5278_v28  ;;  %989 = vmatprep.mubr.f32.mxu0 %v5806_v0  ;;  %v341_v28 = vld [vmem:[#allocation5 + $0x310] sm:$0xff]  ;;  %v5198_v24 = vpack.c.bf16 %v393_v21, %v377_v20  ;;  %v5200_v25 = vpack.c.bf16 %v426_v23, %v410_v22  ;;  %v5268_v21 = vpack.c.bf16 %v462_v17, %v446_v16 }
  0xd0   : > { %5281 = vmatprep.subr.bf16.mxu0 %v5280_v29  ;;  %v357_v29 = vld [vmem:[#allocation5 + $0x390] sm:$0xff]  ;;  %5127 = vmatpush1.bf16.msra.mxu1 %v5126_v26 }
  0xd1   : > { %5129 = vmatprep.subr.bf16.mxu1 %v5128_v27  ;;  %v409_v26 = vld [vmem:[#allocation5 + $0x530] sm:$0xff] }
  0xd2   : > { %v425_v27 = vld [vmem:[#allocation5 + $0x5b0] sm:$0xff] }
  0xd3   : > { %5283 = vmatpush1.bf16.msra.mxu0 %v5282_v32  ;;  %v5130_v32 = vpack.c.bf16 %v357_v29, %v341_v28  ;;  %v442_v28 = vld [vmem:[#allocation5 + $0x638] sm:$0xff]  ;;  %v5202_v30 = vpack.c.bf16 %v425_v27, %v409_v26  ;;  %v397_v9 = vld [vmem:[#allocation5 + $0x4d0] sm:$0xff] }
  0xd4   : > { %5285 = vmatprep.subr.bf16.mxu0 %v5284_v35  ;;  %v389_v35 = vld [vmem:[#allocation5 + $0x490] sm:$0xff]  ;;  %v458_v29 = vld [vmem:[#allocation5 + $0x6b8] sm:$0xff] }
  0xd5   : > { %5131 = vmatpush1.bf16.msra.mxu1 %v5130_v32  ;;  %v5134_v38 = vpack.c.bf16 %v389_v35, %v373_v34  ;;  %v5204_v31 = vpack.c.bf16 %v458_v29, %v442_v28  ;;  %v441_v32 = vld [vmem:[#allocation5 + $0x630] sm:$0xff]  ;;  %v474_v34 = vld [vmem:[#allocation5 + $0x738] sm:$0xff] }
  0xd6   : > { %5133 = vmatprep.subr.bf16.mxu1 %v5132_v33  ;;  %v457_v33 = vld [vmem:[#allocation5 + $0x6b0] sm:$0xff]  ;;  %v490_v35 = vld [vmem:[#allocation5 + $0x7b8] sm:$0xff] }
  0xd7   : > { %5287 = vmatpush1.bf16.msra.mxu0 %v5286_v39  ;;  %v5136_v39 = vpack.c.bf16 %v422_v37, %v406_v36  ;;  %v5206_v36 = vpack.c.bf16 %v457_v33, %v441_v32  ;;  %v5208_v37 = vpack.c.bf16 %v490_v35, %v474_v34  ;;  %v429_v14 = vld [vmem:[#allocation5 + $0x5d0] sm:$0xff] }
  0xd8   : > { %5289 = vmatprep.subr.bf16.mxu0 %v5288_v43  ;;  %v454_v43 = vld [vmem:[#allocation5 + $0x698] sm:$0xff]  ;;  %v445_v22 = vld [vmem:[#allocation5 + $0x650] sm:$0xff] }
  0xd9   : > { %5135 = vmatpush1.bf16.msra.mxu1 %v5134_v38  ;;  %v5140_v45 = vpack.c.bf16 %v454_v43, %v438_v42  ;;  %v473_v38 = vld [vmem:[#allocation5 + $0x730] sm:$0xff]  ;;  %v5244_v43 = vpack.c.bf16 %v270_v41, %v254_v40 }
  0xda   : > { %5137 = vmatprep.subr.bf16.mxu1 %v5136_v39  ;;  %v489_v39 = vld [vmem:[#allocation5 + $0x7b0] sm:$0xff] }
  0xdb   : > { %5291 = vmatpush1.bf16.msra.mxu0 %v5290_v46  ;;  %v437_v46 = vld [vmem:[#allocation5 + $0x610] sm:$0xff]  ;;  %v5210_v42 = vpack.c.bf16 %v489_v39, %v473_v38 }
  0xdc   : > { %5293 = vmatprep.subr.bf16.mxu0 %v5292_v47  ;;  %v453_v47 = vld [vmem:[#allocation5 + $0x690] sm:$0xff] }
  0xdd   : > { %5139 = vmatpush1.bf16.msra.mxu1 %v5138_v44  ;;  %v5142_v50 = vpack.c.bf16 %v453_v47, %v437_v46  ;;  %v253_v44 = vld [vmem:[#allocation5 + $0x50] sm:$0xff]  ;;  %v286_v46 = vld [vmem:[#allocation5 + $0x158] sm:$0xff] }
  0xde   : > { %5141 = vmatprep.subr.bf16.mxu1 %v5140_v45  ;;  %v269_v45 = vld [vmem:[#allocation5 + $0xd0] sm:$0xff]  ;;  %v302_v47 = vld [vmem:[#allocation5 + $0x1d8] sm:$0xff] }
  0xdf   : > { %5295 = vmatpush1.bf16.msra.mxu0 %v5294_v52  ;;  %v469_v52 = vld [vmem:[#allocation5 + $0x710] sm:$0xff]  ;;  %v5246_v48 = vpack.c.bf16 %v269_v45, %v253_v44  ;;  %v5248_v49 = vpack.c.bf16 %v302_v47, %v286_v46 }
  0xe0   : > { %5297 = vmatprep.subr.bf16.mxu0 %v5296_v53  ;;  %v485_v53 = vld [vmem:[#allocation5 + $0x790] sm:$0xff] }
  0xe1   : > { %5143 = vmatpush1.bf16.msra.mxu1 %v5142_v50  ;;  %v5146_v57 = vpack.c.bf16 %v485_v53, %v469_v52  ;;  %v285_v52 = vld [vmem:[#allocation5 + $0x150] sm:$0xff] }
  0xe2   : > { %5145 = vmatprep.subr.bf16.mxu1 %v5144_v51  ;;  %v301_v53 = vld [vmem:[#allocation5 + $0x1d0] sm:$0xff] }
  0xe3   : > { %5299 = vmatpush1.bf16.msra.mxu0 %v5298_v59  ;;  %v249_v59 = vld [vmem:[#allocation5 + $0x30] sm:$0xff]  ;;  %v5250_v54 = vpack.c.bf16 %v301_v53, %v285_v52 }
  0xe4   : > { %5301 = vmatprep.subr.bf16.mxu0 %v5300_v60  ;;  %v265_v60 = vld [vmem:[#allocation5 + $0xb0] sm:$0xff] }
  0xe5   : > { %5147 = vmatpush1.bf16.msra.mxu1 %v5146_v57  ;;  %v5182_v63 = vpack.c.bf16 %v265_v60, %v249_v59  ;;  %v334_v57 = vld [vmem:[#allocation5 + $0x2d8] sm:$0xff]  ;;  %v317_v59 = vld [vmem:[#allocation5 + $0x250] sm:$0xff] }
  0xe6   : > { %5181 = vmatprep.subr.bf16.mxu1 %v5180_v58  ;;  %v5252_v58 = vpack.c.bf16 %v334_v57, %v318_v55  ;;  %v333_v60 = vld [vmem:[#allocation5 + $0x2d0] sm:$0xff]  ;;  %v386_v55 = vld [vmem:[#allocation5 + $0x478] sm:$0xff] }
  0xe7   : > { %5303 = vmatpush1.bf16.msra.mxu0 %v5302_v2  ;;  %v281_v2 = vld [vmem:[#allocation5 + $0x130] sm:$0xff]  ;;  %v5254_v61 = vpack.c.bf16 %v333_v60, %v317_v59  ;;  %v402_v57 = vld [vmem:[#allocation5 + $0x4f8] sm:$0xff] }
  0xe8   : > { %5305 = vmatprep.subr.bf16.mxu0 %v5304_v3  ;;  %v297_v3 = vld [vmem:[#allocation5 + $0x1b0] sm:$0xff]  ;;  %635 = vmatmul.mubr.f32.vlgmr.msra.gmra.mrb[0].mxu1 %v6024_v56  ;;  %v5324_v59 = vpack.c.bf16 %v402_v57, %v386_v55  ;;  %v1324_v55 = vld [vmem:[#allocation7] sm:$0xff]  ;;  %v1325_v57 = vld [vmem:[#allocation7 + $0x8] sm:$0xff] }
  0xe9   : > { %5183 = vmatpush1.bf16.msra.mxu1 %v5182_v63  ;;  %776 = vmatprep.mubr.f32.mxu1 %v5806_v0  ;;  %v366_v63 = vld [vmem:[#allocation5 + $0x3d8] sm:$0xff]  ;;  %v461_v23 = vld [vmem:[#allocation5 + $0x6d0] sm:$0xff] }
  0xea   : > { %5185 = vmatprep.subr.bf16.mxu1 %v5184_v1  ;;  %v349_v1 = vld [vmem:[#allocation5 + $0x350] sm:$0xff]  ;;  %v5270_v26 = vpack.c.bf16 %v461_v23, %v445_v22  ;;  %v1067_v23 = vlaneseq }
  0xeb   : > { %5307 = vmatpush1.bf16.msra.mxu0 %v5306_v6  ;;  %v5186_v6 = vpack.c.bf16 %v297_v3, %v281_v2  ;;  %v5256_v2 = vpack.c.bf16 %v366_v63, %v350_v62  ;;  %v365_v3 = vld [vmem:[#allocation5 + $0x3d0] sm:$0xff]  ;;  %v418_v62 = vld [vmem:[#allocation5 + $0x578] sm:$0xff] }
  0xec   : > { %4660 = vmatprep.subr.mxu0 %v5806_v0  ;;  %v477_v28 = vld [vmem:[#allocation5 + $0x750] sm:$0xff]  ;;  %v434_v63 = vld [vmem:[#allocation5 + $0x5f8] sm:$0xff] }
  0xed   : > { %5187 = vmatpush1.bf16.msra.mxu1 %v5186_v6  ;;  %v5258_v6 = vpack.c.bf16 %v365_v3, %v349_v1  ;;  %v493_v29 = vld [vmem:[#allocation5 + $0x7d0] sm:$0xff] }
  0xee   : > { %990 = vmatmul.mubr.f32.vlgmr.msra.gmra.mrb[6].mxu0 %v6024_v56  ;;  %5189 = vmatprep.subr.bf16.mxu1 %v5188_v7  ;;  %v5260_v7 = vpack.c.bf16 %v398_v5, %v382_v4  ;;  %v5274_v32 = vpack.c.bf16 %v493_v29, %v477_v28  ;;  %v257_v34 = vld [vmem:[#allocation5 + $0x70] sm:$0xff]  ;;  %v450_v5 = vld [vmem:[#allocation5 + $0x678] sm:$0xff] }
  0xef   : > { %4662 = vmatprep.mubr.msk.f32.mxu0 %vm5807_vm0, %v5806_v0  ;;  %v273_v35 = vld [vmem:[#allocation5 + $0xf0] sm:$0xff] }
  0xf0   : > { %v5310_v38 = vpack.c.bf16 %v273_v35, %v257_v34  ;;  %v289_v40 = vld [vmem:[#allocation5 + $0x170] sm:$0xff] }
  0xf1   : > { %5191 = vmatpush1.bf16.msra.mxu1 %v5190_v12  ;;  %v5262_v12 = vpack.c.bf16 %v397_v9, %v381_v8  ;;  %v305_v41 = vld [vmem:[#allocation5 + $0x1f0] sm:$0xff] }
  0xf2   : > { %5193 = vmatprep.subr.bf16.mxu1 %v5192_v13  ;;  %v413_v13 = vld [vmem:[#allocation5 + $0x550] sm:$0xff]  ;;  %v5314_v44 = vpack.c.bf16 %v305_v41, %v289_v40 }
  0xf3   : > { %v321_v46 = vld [vmem:[#allocation5 + $0x270] sm:$0xff] }
  0xf4   : > { %v337_v47 = vld [vmem:[#allocation5 + $0x2f0] sm:$0xff] }
  0xf5   : > { %5195 = vmatpush1.bf16.msra.mxu1 %v5194_v18  ;;  %v353_v53 = vld [vmem:[#allocation5 + $0x370] sm:$0xff] }
  0xf6   : > { %5197 = vmatprep.subr.bf16.mxu1 %v5196_v19  ;;  %v5266_v19 = vpack.c.bf16 %v429_v14, %v413_v13  ;;  %v385_v60 = vld [vmem:[#allocation5 + $0x470] sm:$0xff]  ;;  %v482_v13 = vld [vmem:[#allocation5 + $0x778] sm:$0xff] }
  0xf7   : > { %v417_v3 = vld [vmem:[#allocation5 + $0x570] sm:$0xff]  ;;  %v498_v14 = vld [vmem:[#allocation5 + $0x7f8] sm:$0xff] }
  0xf8   : > { %v433_v4 = vld [vmem:[#allocation5 + $0x5f0] sm:$0xff]  ;;  %v5336_v16 = vpack.c.bf16 %v498_v14, %v482_v13 }
  0xf9   : > { %5199 = vmatpush1.bf16.msra.mxu1 %v5198_v24  ;;  %v478_v24 = vld [vmem:[#allocation5 + $0x758] sm:$0xff]  ;;  %v449_v10 = vld [vmem:[#allocation5 + $0x670] sm:$0xff] }
  0xfa   : > { %5201 = vmatprep.subr.bf16.mxu1 %v5200_v25  ;;  %v494_v25 = vld [vmem:[#allocation5 + $0x7d8] sm:$0xff]  ;;  %v465_v11 = vld [vmem:[#allocation5 + $0x6f0] sm:$0xff] }
  0xfb   : > { %v5272_v27 = vpack.c.bf16 %v494_v25, %v478_v24  ;;  %v481_v17 = vld [vmem:[#allocation5 + $0x770] sm:$0xff]  ;;  %v1068_v24 = vshrl.u32 %v1067_v23, 7  ;;  %v1070_v25 = vand.u32 127, %v1067_v23 }
  0xfc   : > { %v1334_v23 = vld [vmem:[#allocation7 + $0x50] sm:$0xff] }
  0xfd   : > { %5203 = vmatpush1.bf16.msra.mxu1 %v5202_v30  ;;  %v258_v30 = vld [vmem:[#allocation5 + $0x78] sm:$0xff] }
  0xfe   : > { %5205 = vmatprep.subr.bf16.mxu1 %v5204_v31  ;;  %v274_v31 = vld [vmem:[#allocation5 + $0xf8] sm:$0xff] }
  0xff   : > { %v5308_v33 = vpack.c.bf16 %v274_v31, %v258_v30 }
 0x101   : > { %5207 = vmatpush1.bf16.msra.mxu1 %v5206_v36  ;;  %v290_v36 = vld [vmem:[#allocation5 + $0x178] sm:$0xff] }
 0x102   : > { %5209 = vmatprep.subr.bf16.mxu1 %v5208_v37  ;;  %v306_v37 = vld [vmem:[#allocation5 + $0x1f8] sm:$0xff] }
 0x103   : > { %v5312_v39 = vpack.c.bf16 %v306_v37, %v290_v36 }
 0x105   : > { %5211 = vmatpush1.bf16.msra.mxu1 %v5210_v42  ;;  %v322_v42 = vld [vmem:[#allocation5 + $0x278] sm:$0xff] }
 0x106   : > { %5245 = vmatprep.subr.bf16.mxu1 %v5244_v43  ;;  %v338_v43 = vld [vmem:[#allocation5 + $0x2f8] sm:$0xff] }
 0x107   : > { %v5316_v45 = vpack.c.bf16 %v338_v43, %v322_v42 }
 0x108   : > { %777 = vmatmul.mubr.f32.vlgmr.msra.gmra.mrb[2].mxu1 %v6024_v56 }
 0x109   : > { %5247 = vmatpush1.bf16.msra.mxu1 %v5246_v48  ;;  %918 = vmatprep.mubr.f32.mxu1 %v5806_v0  ;;  %v354_v48 = vld [vmem:[#allocation5 + $0x378] sm:$0xff] }
 0x10a   : > { %5249 = vmatprep.subr.bf16.mxu1 %v5248_v49  ;;  %v370_v49 = vld [vmem:[#allocation5 + $0x3f8] sm:$0xff] }
 0x10b   : > { %v5320_v52 = vpack.c.bf16 %v370_v49, %v354_v48 }
 0x10d   : > { %5251 = vmatpush1.bf16.msra.mxu1 %v5250_v54  ;;  %v369_v54 = vld [vmem:[#allocation5 + $0x3f0] sm:$0xff] }
 0x10e   : > { %5253 = vmatprep.subr.bf16.mxu1 %v5252_v58  ;;  %v5322_v58 = vpack.c.bf16 %v369_v54, %v353_v53 }
 0x111   : > { %5255 = vmatpush1.bf16.msra.mxu1 %v5254_v61  ;;  %v401_v61 = vld [vmem:[#allocation5 + $0x4f0] sm:$0xff] }
 0x112   : > { %5257 = vmatprep.subr.bf16.mxu1 %v5256_v2  ;;  %v5326_v1 = vpack.c.bf16 %v401_v61, %v385_v60  ;;  %v5328_v2 = vpack.c.bf16 %v434_v63, %v418_v62  ;;  %v5353_v60 = vpack.c.bf16 %v1325_v57, %v1324_v55  ;;  %v1327_v61 = vld [vmem:[#allocation7 + $0x18] sm:$0xff]  ;;  %v1737_v55 = vld [vmem:[#allocation7 + $0xd0] sm:$0xff] }
 0x115   : > { %5259 = vmatpush1.bf16.msra.mxu1 %v5258_v6  ;;  %v466_v6 = vld [vmem:[#allocation5 + $0x6f8] sm:$0xff] }
 0x116   : > { %5261 = vmatprep.subr.bf16.mxu1 %v5260_v7  ;;  %v5330_v7 = vpack.c.bf16 %v433_v4, %v417_v3  ;;  %v5332_v9 = vpack.c.bf16 %v466_v6, %v450_v5  ;;  %v1328_v3 = vld [vmem:[#allocation7 + $0x20] sm:$0xff]  ;;  %v1329_v4 = vld [vmem:[#allocation7 + $0x28] sm:$0xff] }
 0x119   : > { %5263 = vmatpush1.bf16.msra.mxu1 %v5262_v12 }
 0x11a   : > { %5265 = vmatprep.subr.bf16.mxu1 %v5264_v15  ;;  %v5334_v15 = vpack.c.bf16 %v465_v11, %v449_v10  ;;  %v1330_v10 = vld [vmem:[#allocation7 + $0x30] sm:$0xff]  ;;  %v1331_v11 = vld [vmem:[#allocation7 + $0x38] sm:$0xff] }
 0x11b   : > { %v5362_v13 = vpack.c.bf16 %v1331_v11, %v1330_v10 }
 0x11d   : > { %5267 = vmatpush1.bf16.msra.mxu1 %v5266_v19 }
 0x11e   : > { %5269 = vmatprep.subr.bf16.mxu1 %v5268_v21 }
 0x121   : > { %5271 = vmatpush1.bf16.msra.mxu1 %v5270_v26  ;;  %v1071_v26 = vsub.s32 %v1070_v25, %v1068_v24  ;;  %v1335_v24 = vld [vmem:[#allocation7 + $0x58] sm:$0xff] }
 0x122   : > { %5273 = vmatprep.subr.bf16.mxu1 %v5272_v27  ;;  %v5344_v25 = vpack.c.bf16 %v1335_v24, %v1334_v23  ;;  %v1731_v24 = vld [vmem:[#allocation7 + $0xa0] sm:$0xff] }
 0x123   : > { %v1072_v27 = vcvt.s32.f32 %v1071_v26  ;;  %v1336_v26 = vld [vmem:[#allocation7 + $0x60] sm:$0xff] }
 0x125   : > { %5275 = vmatpush1.bf16.msra.mxu1 %v5274_v32  ;;  %v1073_v28 = vand.u32 2147483647, %v1072_v27  ;;  %v1337_v27 = vld [vmem:[#allocation7 + $0x68] sm:$0xff] }
 0x126   : > { %5309 = vmatprep.subr.bf16.mxu1 %v5308_v33 }
 0x127   : > { %v1074_v29 = vsub.f32 0.0, %v1073_v28  ;;  %v5347_v28 = vpack.c.bf16 %v1337_v27, %v1336_v26  ;;  %v1733_v27 = vld [vmem:[#allocation7 + $0xb0] sm:$0xff] }
 0x128   : > { %919 = vmatmul.mubr.f32.vlgmr.msra.gmra.mrb[4].mxu1 %v6024_v56 }
 0x129   : > { %5311 = vmatpush1.bf16.msra.mxu1 %v5310_v38  ;;  %1060 = vmatprep.mubr.f32.mxu1 %v5806_v0  ;;  %v1076_v30 = vmul.f32 0.36787945, %v1074_v29  ;;  %v1338_v29 = vld [vmem:[#allocation7 + $0x70] sm:$0xff] }
 0x12a   : > { %5313 = vmatprep.subr.bf16.mxu1 %v5312_v39 }
 0x12d   : > { %5315 = vmatpush1.bf16.msra.mxu1 %v5314_v44 }
 0x12e   : > { %5317 = vmatprep.subr.bf16.mxu1 %v5316_v45 }
 0x161   : > { %v565_v50 = vpop.f32.mrb[0].mxu0 }
 0x162   : > { %v6040_v51 = vpop.f32.mrb[1].mxu0 }
 0x181   : > { %v707_v18 = vpop.f32.mrb[2].mxu0 }
 0x182   : > { %1488 = vrot.lane.b32.xlu1 %v707_v18, %s5808_s21  ;;  %v6043_v20 = vpop.f32.mrb[3].mxu0  ;;  %4661 = vmatpush3.xpose.msk.msra.mxu0 %vm1089_vm1, %v707_v18  ;;  %v497_v18 = vld [vmem:[#allocation5 + $0x7f0] sm:$0xff] }
 0x183   : > { %4670 = vmatprep.subr.mxu0 %v5806_v0  ;;  %v5338_v19 = vpack.c.bf16 %v497_v18, %v481_v17 }
 0x185   : > { %4663 = vmatmul.mubr.msk.f32.vlgmr.msra.gmra.mrb[8].mxu0 %vm1089_vm1, %v565_v50 }
 0x186   : > { %1486 = vrot.lane.b32.xlu1 %v565_v50, %s5808_s21  ;;  %4672 = vmatprep.mubr.msk.f32.mxu0 %vm5807_vm0, %v5806_v0  ;;  %v5318_v50 = vpack.c.bf16 %v337_v47, %v321_v46 }
 0x188   : > { %5319 = vmatpush1.bf16.msra.mxu1 %v5318_v50  ;;  %v5809_v50 = vmov 0.0|0.0  }
 0x189   : > { %5321 = vmatprep.subr.bf16.mxu1 %v5320_v52 }
 0x18c   : > { %5323 = vmatpush1.bf16.msra.mxu1 %v5322_v58  ;;  %v1326_v58 = vld [vmem:[#allocation7 + $0x10] sm:$0xff] }
 0x18d   : > { %5325 = vmatprep.subr.bf16.mxu1 %v5324_v59 }
 0x190   : > { %5327 = vmatpush1.bf16.msra.mxu1 %v5326_v1  ;;  %v5356_v1 = vpack.c.bf16 %v1327_v61, %v1326_v58  ;;  %v1738_v58 = vld [vmem:[#allocation7 + $0xd8] sm:$0xff]  ;;  %v1739_v61 = vld [vmem:[#allocation7 + $0xe0] sm:$0xff] }
 0x191   : > { %5329 = vmatprep.subr.bf16.mxu1 %v5328_v2 }
 0x194   : > { %5331 = vmatpush1.bf16.msra.mxu1 %v5330_v7  ;;  %v5359_v7 = vpack.c.bf16 %v1329_v4, %v1328_v3  ;;  %v1741_v4 = vld [vmem:[#allocation7 + $0xf0] sm:$0xff] }
 0x195   : > { %5333 = vmatprep.subr.bf16.mxu1 %v5332_v9 }
 0x198   : > { %5335 = vmatpush1.bf16.msra.mxu1 %v5334_v15  ;;  %v1332_v15 = vld [vmem:[#allocation7 + $0x40] sm:$0xff] }
 0x199   : > { %5337 = vmatprep.subr.bf16.mxu1 %v5336_v16  ;;  %v1333_v16 = vld [vmem:[#allocation7 + $0x48] sm:$0xff] }
 0x19a   : > { %v5341_v18 = vpack.c.bf16 %v1333_v16, %v1332_v15 }
 0x19c   : > { %5339 = vmatpush1.bf16.msra.mxu1 %v5338_v19 }
 0x19d   : > { %4665 = vmatprep.subr.mxu1 %v5806_v0 }
 0x19f   : > { %1061 = vmatmul.mubr.f32.vlgmr.msra.gmra.mrb[6].mxu1 %v6024_v56  ;;  %v1077_v56 = vmul.f32 1.442695, %v1076_v30  ;;  %v1339_v30 = vld [vmem:[#allocation7 + $0x78] sm:$0xff] }
 0x1a0   : > { %4667 = vmatprep.mubr.msk.f32.mxu1 %vm5807_vm0, %v5806_v0 }
 0x1a1   : > { %v6053_v8 = vpop.f32.mrb[4].mxu0  ;;  %5606 = vpow2.f32 %v1077_v56  ;;  %v5350_v56 = vpack.c.bf16 %v1339_v30, %v1338_v29 }
 0x1a2   : > { %v6055_v12 = vpop.f32.mrb[5].mxu0  ;;  %4666 = vmatpush3.msra.mxu1 %v6053_v8 }
 0x1a3   : > { %5340 = vmatprep.subr.bf16.mxu1 %v5809_v50 }
 0x1ab   : > { %v5607_v31 = vpop.eup %5606 }
 0x1ac   : > { %v1080_v32 = vsel %vm1079_vm2, %v5607_v31, 0.0 }
 0x1ad   : > { %v1081_v33 = vrot.slane %v1080_v32, 4 }
 0x1af   : > { %v1082_v34 = vadd.f32 %v1081_v33, %v1080_v32 }
 0x1b1   : > { %v1083_v35 = vrot.slane %v1082_v34, 2 }
 0x1b3   : > { %v1084_v36 = vadd.f32 %v1083_v35, %v1082_v34 }
 0x1b5   : > { %v1085_v37 = vrot.slane %v1084_v36, 1 }
 0x1b7   : > { %v1086_v38 = vadd.f32 %v1085_v37, %v1084_v36 }
 0x1b9   : > { %5608 = vrcp.f32 %v1086_v38 }
 0x1bb   : > { %v6078_v54 = vpop.f32.mrb[0].mxu1 }
 0x1bc   : > { %v6080_v59 = vpop.f32.mrb[1].mxu1 }
 0x1c1   : > { %v6062_v21 = vpop.f32.mrb[6].mxu0 }
 0x1c2   : > { %v6064_v22 = vpop.f32.mrb[7].mxu0  ;;  %4671 = vmatpush3.msra.mxu0 %v6062_v21 }
 0x1c3   : > { %v5609_v39 = vpop.eup %5608  ;;  %5352 = vmatprep.subr.bf16.mxu0 %v5809_v50 }
 0x1c4   : > { %v6068_v40 = vmul.f32 %v5609_v39, %v5607_v31 }
 0x1c6   : > { %4673 = vmatmul.mubr.msk.f32.vlgmr.msra.gmra.mrb[10].mxu0 %vm1079_vm2, %v6068_v40 }
 0x1c7   : > { %4710 = vmatprep.mubr.msk.f32.mxu0 %vm5807_vm0, %v5806_v0  ;;  %5354 = vmatpush3.bf16.msra.mxu0 %v5353_v60  ;;  %v5380_v60 = vpack.c.bf16 %v1738_v58, %v1737_v55  ;;  %v2134_v55 = vld [vmem:[#allocation7 + $0x160] sm:$0xff]  ;;  %v2135_v58 = vld [vmem:[#allocation7 + $0x168] sm:$0xff] }
 0x1c8   : > { %5355 = vmatprep.subr.bf16.mxu0 %v5809_v50 }
 0x1cb   : > { %5357 = vmatpush3.bf16.msra.mxu0 %v5356_v1  ;;  %v1740_v1 = vld [vmem:[#allocation7 + $0xe8] sm:$0xff] }
 0x1cc   : > { %5358 = vmatprep.subr.bf16.mxu0 %v5809_v50  ;;  %v5383_v3 = vpack.c.bf16 %v1740_v1, %v1739_v61  ;;  %v2123_v61 = vld [vmem:[#allocation7 + $0x108] sm:$0xff] }
 0x1cf   : > { %5360 = vmatpush3.bf16.msra.mxu0 %v5359_v7  ;;  %v1742_v7 = vld [vmem:[#allocation7 + $0xf8] sm:$0xff] }
 0x1d0   : > { %5361 = vmatprep.subr.bf16.mxu0 %v5809_v50  ;;  %v5386_v10 = vpack.c.bf16 %v1742_v7, %v1741_v4  ;;  %v2124_v7 = vld [vmem:[#allocation7 + $0x110] sm:$0xff] }
 0x1d3   : > { %5363 = vmatpush3.bf16.msra.mxu0 %v5362_v13  ;;  %v1727_v13 = vld [vmem:[#allocation7 + $0x80] sm:$0xff] }
 0x1d4   : > { %4718 = vmatprep.subr.mxu0 %v5806_v0 }
 0x1db   : > { %v6082_v62 = vpop.f32.mrb[2].mxu1 }
 0x1dc   : > { %v6084_v63 = vpop.f32.mrb[3].mxu1 }
 0x1f4   : > { %v1489_v31 = vpop.permute.xlu1 %1488 }
 0x1f8   : > { %v1487_v32 = vpop.permute.xlu1 %1486 }
 0x1fb   : > { %v6086_v2 = vpop.f32.mrb[4].mxu1 }
 0x1fc   : > { %v6089_v5 = vpop.f32.mrb[5].mxu1 }
 0x258   : > { %v1162_v41 = vpop.f32.mrb[8].mxu0 }
 0x259   : > { %v1166_v42 = vmul.f32 0.125, %v1162_v41  ;;  %v4664_v43 = vpop.f32.mrb[9].mxu0 }
 0x25b   : > { %v1167_v44 = vsel %vm1079_vm2, %v1166_v42, -inf }
 0x25c   : > { %1168 = vmax.xlane.f32.xlu0 %v1167_v44 }
 0x272   : > { %v6091_v6 = vpop.f32.mrb[6].mxu1 }
 0x273   : > { %v6093_v9 = vpop.f32.mrb[7].mxu1 }
 0x299   : > { %v1320_v52 = vpop.f32.mrb[10].mxu0 }
 0x29a   : > { %v4674_v53 = vpop.f32.mrb[11].mxu0 }
 0x29b   : > { %v1736_v53 = vld [vmem:[#allocation7 + $0xc8] sm:$0xff] }
 0x2e9   : > { %v1169_v45 = vpop.xlane.xlu0 %1168 }
 0x2ea   : > { %v1170_v46 = vsub.f32 %v1166_v42, %v1169_v45 }
 0x2ec   : > { %v1171_v47 = vmul.f32 1.442695, %v1170_v46 }
 0x2ee   : > { %5610 = vpow2.f32 %v1171_v47 }
 0x2f8   : > { %v5611_v48 = vpop.eup %5610 }
 0x2f9   : > { %v1173_v49 = vsel %vm1079_vm2, %v5611_v48, 0.0 }
 0x2fa   : > { %1174 = vadd.xlane.f32.xlu0 %v1173_v49 }
 0x387   : > { %v1175_v14 = vpop.xlane.xlu0 %1174 }
 0x388   : > { %5612 = vrcp.f32 %v1175_v14  ;;  %v1728_v14 = vld [vmem:[#allocation7 + $0x88] sm:$0xff] }
 0x389   : > { %v5365_v16 = vpack.c.bf16 %v1728_v14, %v1727_v13  ;;  %v2126_v13 = vld [vmem:[#allocation7 + $0x120] sm:$0xff]  ;;  %v2127_v14 = vld [vmem:[#allocation7 + $0x128] sm:$0xff] }
 0x392   : > { %v5613_v17 = vpop.eup %5612 }
 0x393   : > { %v1177_v19 = vmul.f32 %v5613_v17, %v5611_v48 }
 0x395   : > { %4668 = vmatmul.mubr.msk.f32.vlgmr.msra.gmra.mrb[8].mxu1 %vm1079_vm2, %v1177_v19  ;;  %v1730_v19 = vld [vmem:[#allocation7 + $0x98] sm:$0xff] }
 0x396   : > { %5342 = vmatpush3.bf16.msra.mxu1 %v5341_v18  ;;  %4691 = vmatprep.mubr.msk.f32.mxu1 %vm5807_vm0, %v5806_v0  ;;  %v1729_v18 = vld [vmem:[#allocation7 + $0x90] sm:$0xff] }
 0x397   : > { %5343 = vmatprep.subr.bf16.mxu1 %v5809_v50  ;;  %v5368_v23 = vpack.c.bf16 %v1730_v19, %v1729_v18  ;;  %v2136_v19 = vld [vmem:[#allocation7 + $0x170] sm:$0xff] }
 0x39a   : > { %5345 = vmatpush3.bf16.msra.mxu1 %v5344_v25  ;;  %v1732_v25 = vld [vmem:[#allocation7 + $0xa8] sm:$0xff] }
 0x39b   : > { %5346 = vmatprep.subr.bf16.mxu1 %v5809_v50  ;;  %v5371_v26 = vpack.c.bf16 %v1732_v25, %v1731_v24 }
 0x39e   : > { %5348 = vmatpush3.bf16.msra.mxu1 %v5347_v28  ;;  %v1734_v28 = vld [vmem:[#allocation7 + $0xb8] sm:$0xff] }
 0x39f   : > { %5349 = vmatprep.subr.bf16.mxu1 %v5809_v50  ;;  %v5374_v29 = vpack.c.bf16 %v1734_v28, %v1733_v27 }
 0x3a2   : > { %5351 = vmatpush3.bf16.msra.mxu1 %v5350_v56 }
 0x3a3   : > { %4713 = vmatprep.subr.mxu1 %v5806_v0 }
 0x3a5   : > { %4692 = vmatmul.mubr.msk.f32.vlgmr.msra.gmra.mrb[10].mxu1 %vm1089_vm1, %v1320_v52  ;;  %v1735_v52 = vld [vmem:[#allocation7 + $0xc0] sm:$0xff] }
 0x3a6   : > { %4715 = vmatprep.mubr.msk.f32.mxu1 %vm5807_vm0, %v5806_v0  ;;  %v5377_v57 = vpack.c.bf16 %v1736_v53, %v1735_v52  ;;  %v2132_v52 = vld [vmem:[#allocation7 + $0x150] sm:$0xff]  ;;  %v2133_v53 = vld [vmem:[#allocation7 + $0x158] sm:$0xff] }
 0x3ab   : > { %4714 = vmatpush3.xpose.msk.msra.mxu1 %vm1089_vm1, %v1489_v31 }
 0x3ac   : > { %4723 = vmatprep.subr.mxu1 %v5806_v0 }
 0x3ae   : > { %4716 = vmatmul.mubr.msk.f32.vlgmr.msra.gmra.mrb[12].mxu1 %vm1089_vm1, %v1487_v32 }
 0x3af   : > { %4725 = vmatprep.mubr.msk.f32.mxu1 %vm5807_vm0, %v5806_v0 }
 0x468   : > { %v1247_v33 = vpop.f32.mrb[8].mxu1 }
 0x469   : > { %v4669_v34 = vpop.f32.mrb[9].mxu1  ;;  %4711 = vmatmul.mubr.msk.f32.vlgmr.msra.gmra.mrb[12].mxu0 %vm1089_vm1, %v1247_v33 }
 0x46a   : > { %4720 = vmatprep.mubr.msk.f32.mxu0 %vm5807_vm0, %v5806_v0 }
 0x478   : > { %v1409_v35 = vpop.f32.mrb[10].mxu1 }
 0x479   : > { %v4693_v36 = vpop.f32.mrb[11].mxu1 }
 0x481   : > { %v1560_v37 = vpop.f32.mrb[12].mxu1 }
 0x482   : > { %v1564_v38 = vmul.f32 0.125, %v1560_v37  ;;  %v4717_v39 = vpop.f32.mrb[13].mxu1 }
 0x484   : > { %v1565_v41 = vsel %vm1079_vm2, %v1564_v38, -inf }
 0x485   : > { %1566 = vmax.xlane.f32.xlu0 %v1565_v41 }
 0x49b   : > { %1577 = vrot.lane.b32.xlu0 %v6053_v8, %s5808_s21 }
 0x49f   : > { %1654 = vrot.lane.b32.xlu0 %v6062_v21, %s5808_s21 }
 0x512   : > { %v1567_v42 = vpop.xlane.xlu0 %1566 }
 0x513   : > { %v1568_v43 = vsub.f32 %v1564_v38, %v1567_v42 }
 0x515   : > { %v1569_v44 = vmul.f32 1.442695, %v1568_v43 }
 0x516   : > { %v1578_v45 = vpop.permute.xlu0 %1577 }
 0x517   : > { %5614 = vpow2.f32 %v1569_v44  ;;  %4719 = vmatpush3.msra.mxu0 %v1578_v45 }
 0x518   : > { %5364 = vmatprep.subr.bf16.mxu0 %v5809_v50 }
 0x51a   : > { %v1655_v46 = vpop.permute.xlu0 %1654 }
 0x51b   : > { %4724 = vmatpush3.msra.mxu1 %v1655_v46 }
 0x51c   : > { %4726 = vmatmul.mubr.msk.f32.vlgmr.msra.gmra.mrb[14].mxu1 %vm1079_vm2, %v6068_v40  ;;  %5376 = vmatprep.subr.bf16.mxu1 %v5809_v50 }
 0x51d   : > { %4763 = vmatprep.mubr.msk.f32.mxu1 %vm5807_vm0, %v5806_v0  ;;  %5378 = vmatpush3.bf16.msra.mxu1 %v5377_v57  ;;  %v5404_v57 = vpack.c.bf16 %v2133_v53, %v2132_v52  ;;  %v2539_v52 = vld [vmem:[#allocation7 + $0x1e0] sm:$0xff]  ;;  %v2540_v53 = vld [vmem:[#allocation7 + $0x1e8] sm:$0xff] }
 0x51e   : > { %5379 = vmatprep.subr.bf16.mxu1 %v5809_v50 }
 0x521   : > { %v5615_v8 = vpop.eup %5614  ;;  %5381 = vmatpush3.bf16.msra.mxu1 %v5380_v60  ;;  %v5407_v60 = vpack.c.bf16 %v2135_v58, %v2134_v55  ;;  %v5431_v55 = vpack.c.bf16 %v2540_v53, %v2539_v52  ;;  %v2542_v58 = vld [vmem:[#allocation7 + $0x1f8] sm:$0xff]  ;;  %v2924_v52 = vld [vmem:[#allocation7 + $0x210] sm:$0xff] }
 0x522   : > { %v1571_v21 = vsel %vm1079_vm2, %v5615_v8, 0.0  ;;  %5382 = vmatprep.subr.bf16.mxu1 %v5809_v50  ;;  %v2925_v53 = vld [vmem:[#allocation7 + $0x218] sm:$0xff] }
 0x523   : > { %1572 = vadd.xlane.f32.xlu1 %v1571_v21 }
 0x525   : > { %5384 = vmatpush3.bf16.msra.mxu1 %v5383_v3 }
 0x526   : > { %5385 = vmatprep.subr.bf16.mxu1 %v5809_v50 }
 0x529   : > { %5387 = vmatpush3.bf16.msra.mxu1 %v5386_v10  ;;  %v2125_v10 = vld [vmem:[#allocation7 + $0x118] sm:$0xff] }
 0x52a   : > { %4771 = vmatprep.subr.mxu1 %v5806_v0 }
 0x53c   : > { %v1482_v47 = vpop.f32.mrb[12].mxu0 }
 0x53d   : > { %v6128_v48 = vadd.f32 %v1482_v47, %v1409_v35  ;;  %v4712_v49 = vpop.f32.mrb[13].mxu0  ;;  %v2130_v47 = vld [vmem:[#allocation7 + $0x140] sm:$0xff] }
 0x5b0   : > { %v1573_v11 = vpop.xlane.xlu1 %1572 }
 0x5b1   : > { %5616 = vrcp.f32 %v1573_v11  ;;  %v5392_v11 = vpack.c.bf16 %v2125_v10, %v2124_v7  ;;  %v2529_v7 = vld [vmem:[#allocation7 + $0x190] sm:$0xff]  ;;  %v2530_v10 = vld [vmem:[#allocation7 + $0x198] sm:$0xff] }
 0x5bb   : > { %v5617_v15 = vpop.eup %5616 }
 0x5bc   : > { %v1575_v17 = vmul.f32 %v5617_v15, %v5615_v8  ;;  %v5395_v15 = vpack.c.bf16 %v2127_v14, %v2126_v13  ;;  %v2531_v13 = vld [vmem:[#allocation7 + $0x1a0] sm:$0xff]  ;;  %v2532_v14 = vld [vmem:[#allocation7 + $0x1a8] sm:$0xff] }
 0x5be   : > { %4721 = vmatmul.mubr.msk.f32.vlgmr.msra.gmra.mrb[14].mxu0 %vm1079_vm2, %v1575_v17  ;;  %v2129_v17 = vld [vmem:[#allocation7 + $0x138] sm:$0xff] }
 0x5bf   : > { %5366 = vmatpush3.bf16.msra.mxu0 %v5365_v16  ;;  %4744 = vmatprep.mubr.msk.f32.mxu0 %vm5807_vm0, %v5806_v0  ;;  %v2128_v16 = vld [vmem:[#allocation7 + $0x130] sm:$0xff] }
 0x5c0   : > { %5367 = vmatprep.subr.bf16.mxu0 %v5809_v50  ;;  %v5398_v18 = vpack.c.bf16 %v2129_v17, %v2128_v16  ;;  %v2533_v16 = vld [vmem:[#allocation7 + $0x1b0] sm:$0xff]  ;;  %v2534_v17 = vld [vmem:[#allocation7 + $0x1b8] sm:$0xff] }
 0x5c3   : > { %5369 = vmatpush3.bf16.msra.mxu0 %v5368_v23  ;;  %v2137_v23 = vld [vmem:[#allocation7 + $0x178] sm:$0xff] }
 0x5c4   : > { %5370 = vmatprep.subr.bf16.mxu0 %v5809_v50  ;;  %v5410_v24 = vpack.c.bf16 %v2137_v23, %v2136_v19 }
 0x5c7   : > { %5372 = vmatpush3.bf16.msra.mxu0 %v5371_v26 }
 0x5c8   : > { %5373 = vmatprep.subr.bf16.mxu0 %v5809_v50 }
 0x5cb   : > { %5375 = vmatpush3.bf16.msra.mxu0 %v5374_v29 }
 0x5cc   : > { %4766 = vmatprep.subr.mxu0 %v5806_v0 }
 0x5ef   : > { %v1723_v30 = vpop.f32.mrb[14].mxu1 }
 0x5f0   : > { %4764 = vmatmul.mubr.msk.f32.vlgmr.msra.gmra.mrb[16].mxu1 %vm1089_vm1, %v1723_v30  ;;  %v4727_v56 = vpop.f32.mrb[15].mxu1 }
 0x5f1   : > { %4772 = vmatpush3.msra.mxu1 %v6055_v12  ;;  %4773 = vmatprep.mubr.msk.f32.mxu1 %vm5807_vm0, %v5806_v0 }
 0x5f2   : > { %5388 = vmatprep.subr.bf16.mxu1 %v5809_v50 }
 0x691   : > { %v1649_v31 = vpop.f32.mrb[14].mxu0 }
 0x692   : > { %v4722_v32 = vpop.f32.mrb[15].mxu0  ;;  %4745 = vmatmul.mubr.msk.f32.vlgmr.msra.gmra.mrb[16].mxu0 %vm1089_vm1, %v1649_v31 }
 0x693   : > { %4767 = vmatpush3.xpose.msk.msra.mxu0 %vm1089_vm1, %v6043_v20  ;;  %4768 = vmatprep.mubr.msk.f32.mxu0 %vm5807_vm0, %v5806_v0 }
 0x694   : > { %4776 = vmatprep.subr.mxu0 %v5806_v0 }
 0x696   : > { %4769 = vmatmul.mubr.msk.f32.vlgmr.msra.gmra.mrb[18].mxu0 %vm1089_vm1, %v6040_v51 }
 0x697   : > { %4777 = vmatpush3.msra.mxu0 %v6064_v22  ;;  %4778 = vmatprep.mubr.msk.f32.mxu0 %vm5807_vm0, %v5806_v0 }
 0x698   : > { %5400 = vmatprep.subr.bf16.mxu0 %v5809_v50 }
 0x69a   : > { %4779 = vmatmul.mubr.msk.f32.vlgmr.msra.gmra.mrb[20].mxu0 %vm1079_vm2, %v6068_v40 }
 0x69b   : > { %4816 = vmatprep.mubr.msk.f32.mxu0 %vm5807_vm0, %v5806_v0 }
 0x6c3   : > { %v1886_v33 = vpop.f32.mrb[16].mxu1 }
 0x6c4   : > { %v4765_v34 = vpop.f32.mrb[17].mxu1 }
 0x765   : > { %v1812_v35 = vpop.f32.mrb[16].mxu0 }
 0x766   : > { %v1816_v36 = vadd.f32 %v1812_v35, %v6128_v48  ;;  %v4746_v37 = vpop.f32.mrb[17].mxu0  ;;  %v2131_v48 = vld [vmem:[#allocation7 + $0x148] sm:$0xff] }
 0x767   : > { %v5401_v49 = vpack.c.bf16 %v2131_v48, %v2130_v47  ;;  %v2538_v48 = vld [vmem:[#allocation7 + $0x1d8] sm:$0xff] }
 0x768   : > { %v6163_v38 = vadd.f32 %v1886_v33, %v1816_v36 }
 0x769   : > { %v1963_v39 = vpop.f32.mrb[18].mxu0  ;;  %5402 = vmatpush3.bf16.msra.mxu0 %v5401_v49 }
 0x76a   : > { %v1967_v41 = vmul.f32 0.125, %v1963_v39  ;;  %v4770_v42 = vpop.f32.mrb[19].mxu0  ;;  %5403 = vmatprep.subr.bf16.mxu0 %v5809_v50 }
 0x76c   : > { %v1968_v43 = vsel %vm1079_vm2, %v1967_v41, -inf }
 0x76d   : > { %1969 = vmax.xlane.f32.xlu0 %v1968_v43  ;;  %5405 = vmatpush3.bf16.msra.mxu0 %v5404_v57  ;;  %v2118_v25 = vpop.f32.mrb[20].mxu0  ;;  %v2541_v57 = vld [vmem:[#allocation7 + $0x1f0] sm:$0xff] }
 0x76e   : > { %5406 = vmatprep.subr.bf16.mxu0 %v5809_v50  ;;  %v4780_v26 = vpop.f32.mrb[21].mxu0 }
 0x771   : > { %5408 = vmatpush3.bf16.msra.mxu0 %v5407_v60  ;;  %v5434_v60 = vpack.c.bf16 %v2542_v58, %v2541_v57  ;;  %v2926_v57 = vld [vmem:[#allocation7 + $0x220] sm:$0xff]  ;;  %v2927_v58 = vld [vmem:[#allocation7 + $0x228] sm:$0xff] }
 0x772   : > { %5409 = vmatprep.subr.bf16.mxu0 %v5809_v50 }
 0x775   : > { %5411 = vmatpush3.bf16.msra.mxu0 %v5410_v24 }
 0x776   : > { %4824 = vmatprep.subr.mxu0 %v5806_v0 }
 0x778   : > { %4817 = vmatmul.mubr.msk.f32.vlgmr.msra.gmra.mrb[22].mxu0 %vm1089_vm1, %v2118_v25 }
 0x779   : > { %4826 = vmatprep.mubr.msk.f32.mxu0 %vm5807_vm0, %v5806_v0 }
 0x7fa   : > { %v1970_v44 = vpop.xlane.xlu0 %1969 }
 0x7fb   : > { %v1971_v45 = vsub.f32 %v1967_v41, %v1970_v44 }
 0x7fd   : > { %v1972_v46 = vmul.f32 1.442695, %v1971_v45 }
 0x7ff   : > { %5618 = vpow2.f32 %v1972_v46  ;;  %v2535_v46 = vld [vmem:[#allocation7 + $0x1c0] sm:$0xff] }
 0x809   : > { %v5619_v8 = vpop.eup %5618 }
 0x80a   : > { %v1974_v21 = vsel %vm1079_vm2, %v5619_v8, 0.0 }
 0x80b   : > { %1975 = vadd.xlane.f32.xlu1 %v1974_v21  ;;  %v2537_v21 = vld [vmem:[#allocation7 + $0x1d0] sm:$0xff] }
 0x80c   : > { %v5428_v49 = vpack.c.bf16 %v2538_v48, %v2537_v21  ;;  %v2923_v21 = vld [vmem:[#allocation7 + $0x208] sm:$0xff] }
 0x81c   : > { %2288 = vrot.lane.b32.xlu1 %v6043_v20, %s5808_s21 }
 0x820   : > { %2286 = vrot.lane.b32.xlu1 %v6040_v51, %s5808_s21  ;;  %v2122_v51 = vld [vmem:[#allocation7 + $0x100] sm:$0xff] }
 0x821   : > { %v5389_v3 = vpack.c.bf16 %v2123_v61, %v2122_v51  ;;  %v2527_v51 = vld [vmem:[#allocation7 + $0x180] sm:$0xff]  ;;  %v2528_v61 = vld [vmem:[#allocation7 + $0x188] sm:$0xff] }
 0x84b   : > { %v2281_v56 = vpop.f32.mrb[22].mxu0 }
 0x84c   : > { %v4818_v31 = vpop.f32.mrb[23].mxu0 }
 0x898   : > { %v1976_v20 = vpop.xlane.xlu1 %1975 }
 0x899   : > { %5620 = vrcp.f32 %v1976_v20 }
 0x89c   : > { %v2289_v27 = vpop.permute.xlu1 %2288 }
 0x8a0   : > { %v2287_v30 = vpop.permute.xlu1 %2286 }
 0x8a3   : > { %v5621_v1 = vpop.eup %5620 }
 0x8a4   : > { %v1978_v4 = vmul.f32 %v5621_v1, %v5619_v8  ;;  %v2536_v8 = vld [vmem:[#allocation7 + $0x1c8] sm:$0xff] }
 0x8a5   : > { %v5425_v47 = vpack.c.bf16 %v2536_v8, %v2535_v46  ;;  %v2935_v46 = vld [vmem:[#allocation7 + $0x268] sm:$0xff] }
 0x8a6   : > { %4774 = vmatmul.mubr.msk.f32.vlgmr.msra.gmra.mrb[18].mxu1 %vm1079_vm2, %v1978_v4 }
 0x8a7   : > { %5390 = vmatpush3.bf16.msra.mxu1 %v5389_v3  ;;  %4797 = vmatprep.mubr.msk.f32.mxu1 %vm5807_vm0, %v5806_v0  ;;  %v5413_v3 = vpack.c.bf16 %v2528_v61, %v2527_v51  ;;  %v2929_v51 = vld [vmem:[#allocation7 + $0x238] sm:$0xff] }
 0x8a8   : > { %5391 = vmatprep.subr.bf16.mxu1 %v5809_v50 }
 0x8ab   : > { %5393 = vmatpush3.bf16.msra.mxu1 %v5392_v11  ;;  %v5416_v11 = vpack.c.bf16 %v2530_v10, %v2529_v7 }
 0x8ac   : > { %5394 = vmatprep.subr.bf16.mxu1 %v5809_v50 }
 0x8af   : > { %5396 = vmatpush3.bf16.msra.mxu1 %v5395_v15  ;;  %v5419_v15 = vpack.c.bf16 %v2532_v14, %v2531_v13 }
 0x8b0   : > { %5397 = vmatprep.subr.bf16.mxu1 %v5809_v50 }
 0x8b3   : > { %5399 = vmatpush3.bf16.msra.mxu1 %v5398_v18  ;;  %v5422_v18 = vpack.c.bf16 %v2534_v17, %v2533_v16 }
 0x8b4   : > { %4819 = vmatprep.subr.mxu1 %v5806_v0 }
 0x979   : > { %v2048_v28 = vpop.f32.mrb[18].mxu1 }
 0x97a   : > { %v4775_v29 = vpop.f32.mrb[19].mxu1  ;;  %4798 = vmatmul.mubr.msk.f32.vlgmr.msra.gmra.mrb[20].mxu1 %vm1089_vm1, %v2048_v28 }
 0x97b   : > { %4820 = vmatpush3.xpose.msk.msra.mxu1 %vm1089_vm1, %v2289_v27  ;;  %4821 = vmatprep.mubr.msk.f32.mxu1 %vm5807_vm0, %v5806_v0 }
 0x97c   : > { %4829 = vmatprep.subr.mxu1 %v5806_v0 }
 0x97e   : > { %4822 = vmatmul.mubr.msk.f32.vlgmr.msra.gmra.mrb[22].mxu1 %vm1089_vm1, %v2287_v30 }
 0x97f   : > { %4831 = vmatprep.mubr.msk.f32.mxu1 %vm5807_vm0, %v5806_v0 }
 0xa4d   : > { %v2207_v32 = vpop.f32.mrb[20].mxu1 }
 0xa4e   : > { %v2211_v33 = vadd.f32 %v2207_v32, %v6163_v38  ;;  %v4799_v34 = vpop.f32.mrb[21].mxu1 }
 0xa50   : > { %v6194_v35 = vadd.f32 %v2281_v56, %v2211_v33 }
 0xa51   : > { %v2360_v36 = vpop.f32.mrb[22].mxu1 }
 0xa52   : > { %v2364_v37 = vmul.f32 0.125, %v2360_v36  ;;  %v4823_v39 = vpop.f32.mrb[23].mxu1 }
 0xa54   : > { %v2365_v41 = vsel %vm1079_vm2, %v2364_v37, -inf }
 0xa55   : > { %2366 = vmax.xlane.f32.xlu0 %v2365_v41 }
 0xa6b   : > { %2377 = vrot.lane.b32.xlu0 %v6055_v12, %s5808_s21 }
 0xa6f   : > { %2454 = vrot.lane.b32.xlu0 %v6064_v22, %s5808_s21 }
 0xae2   : > { %v2367_v42 = vpop.xlane.xlu0 %2366 }
 0xae3   : > { %v2368_v43 = vsub.f32 %v2364_v37, %v2367_v42 }
 0xae5   : > { %v2369_v44 = vmul.f32 1.442695, %v2368_v43  ;;  %v2931_v43 = vld [vmem:[#allocation7 + $0x248] sm:$0xff] }
 0xae6   : > { %v2378_v45 = vpop.permute.xlu0 %2377 }
 0xae7   : > { %5622 = vpow2.f32 %v2369_v44  ;;  %4825 = vmatpush3.msra.mxu0 %v2378_v45  ;;  %v2932_v45 = vld [vmem:[#allocation7 + $0x250] sm:$0xff] }
 0xae8   : > { %5412 = vmatprep.subr.bf16.mxu0 %v5809_v50 }
 0xaea   : > { %v2455_v38 = vpop.permute.xlu0 %2454 }
 0xaeb   : > { %4830 = vmatpush3.msra.mxu1 %v2455_v38  ;;  %v2933_v38 = vld [vmem:[#allocation7 + $0x258] sm:$0xff] }
 0xaec   : > { %4832 = vmatmul.mubr.msk.f32.vlgmr.msra.gmra.mrb[24].mxu1 %vm1079_vm2, %v6068_v40  ;;  %5424 = vmatprep.subr.bf16.mxu1 %v5809_v50 }
 0xaed   : > { %4869 = vmatprep.mubr.msk.f32.mxu1 %vm5807_vm0, %v5806_v0  ;;  %5426 = vmatpush3.bf16.msra.mxu1 %v5425_v47 }
 0xaee   : > { %5427 = vmatprep.subr.bf16.mxu1 %v5809_v50 }
 0xaf1   : > { %v5623_v12 = vpop.eup %5622  ;;  %5429 = vmatpush3.bf16.msra.mxu1 %v5428_v49 }
 0xaf2   : > { %v2371_v22 = vsel %vm1079_vm2, %v5623_v12, 0.0  ;;  %5430 = vmatprep.subr.bf16.mxu1 %v5809_v50 }
 0xaf3   : > { %2372 = vadd.xlane.f32.xlu1 %v2371_v22  ;;  %v5452_v22 = vpack.c.bf16 %v2933_v38, %v2932_v45  ;;  %v3342_v45 = vld [vmem:[#allocation7 + $0x2f8] sm:$0xff] }
 0xaf5   : > { %5432 = vmatpush3.bf16.msra.mxu1 %v5431_v55  ;;  %v5440_v55 = vpack.c.bf16 %v2925_v53, %v2924_v52  ;;  %v3332_v52 = vld [vmem:[#allocation7 + $0x2a8] sm:$0xff] }
 0xaf6   : > { %5433 = vmatprep.subr.bf16.mxu1 %v5809_v50 }
 0xaf9   : > { %5435 = vmatpush3.bf16.msra.mxu1 %v5434_v60  ;;  %v5443_v60 = vpack.c.bf16 %v2927_v58, %v2926_v57  ;;  %v3334_v57 = vld [vmem:[#allocation7 + $0x2b8] sm:$0xff] }
 0xafa   : > { %4877 = vmatprep.subr.mxu1 %v5806_v0 }
 0xb80   : > { %v2373_v20 = vpop.xlane.xlu1 %2372 }
 0xb81   : > { %5624 = vrcp.f32 %v2373_v20  ;;  %v2928_v20 = vld [vmem:[#allocation7 + $0x230] sm:$0xff] }
 0xb82   : > { %v5446_v61 = vpack.c.bf16 %v2929_v51, %v2928_v20 }
 0xb8b   : > { %v5625_v1 = vpop.eup %5624 }
 0xb8c   : > { %v2375_v4 = vmul.f32 %v5625_v1, %v5623_v12  ;;  %v2934_v12 = vld [vmem:[#allocation7 + $0x260] sm:$0xff]  ;;  %v2936_v1 = vld [vmem:[#allocation7 + $0x270] sm:$0xff] }
 0xb8d   : > { %v5455_v8 = vpack.c.bf16 %v2935_v46, %v2934_v12  ;;  %v3328_v46 = vld [vmem:[#allocation7 + $0x288] sm:$0xff] }
 0xb8e   : > { %4827 = vmatmul.mubr.msk.f32.vlgmr.msra.gmra.mrb[24].mxu0 %vm1079_vm2, %v2375_v4 }
 0xb8f   : > { %5414 = vmatpush3.bf16.msra.mxu0 %v5413_v3  ;;  %4850 = vmatprep.mubr.msk.f32.mxu0 %vm5807_vm0, %v5806_v0  ;;  %v2937_v3 = vld [vmem:[#allocation7 + $0x278] sm:$0xff] }
 0xb90   : > { %5415 = vmatprep.subr.bf16.mxu0 %v5809_v50  ;;  %v5458_v4 = vpack.c.bf16 %v2937_v3, %v2936_v1 }
 0xb93   : > { %5417 = vmatpush3.bf16.msra.mxu0 %v5416_v11 }
 0xb94   : > { %5418 = vmatprep.subr.bf16.mxu0 %v5809_v50 }
 0xb97   : > { %5420 = vmatpush3.bf16.msra.mxu0 %v5419_v15 }
 0xb98   : > { %5421 = vmatprep.subr.bf16.mxu0 %v5809_v50 }
 0xb9b   : > { %5423 = vmatpush3.bf16.msra.mxu0 %v5422_v18 }
 0xb9c   : > { %4872 = vmatprep.subr.mxu0 %v5806_v0 }
 0xbbf   : > { %v2523_v19 = vpop.f32.mrb[24].mxu1 }
 0xbc0   : > { %4870 = vmatmul.mubr.msk.f32.vlgmr.msra.gmra.mrb[26].mxu1 %vm1089_vm1, %v2523_v19  ;;  %v4833_v23 = vpop.f32.mrb[25].mxu1 }
 0xbc1   : > { %4878 = vmatpush3.msra.mxu1 %v6086_v2  ;;  %4879 = vmatprep.mubr.msk.f32.mxu1 %vm5807_vm0, %v5806_v0 }
 0xbc2   : > { %5436 = vmatprep.subr.bf16.mxu1 %v5809_v50 }
 0xc61   : > { %v2449_v24 = vpop.f32.mrb[24].mxu0 }
 0xc62   : > { %v4828_v25 = vpop.f32.mrb[25].mxu0  ;;  %4851 = vmatmul.mubr.msk.f32.vlgmr.msra.gmra.mrb[26].mxu0 %vm1089_vm1, %v2449_v24 }
 0xc63   : > { %4873 = vmatpush3.xpose.msk.msra.mxu0 %vm1089_vm1, %v6082_v62  ;;  %4874 = vmatprep.mubr.msk.f32.mxu0 %vm5807_vm0, %v5806_v0 }
 0xc64   : > { %4882 = vmatprep.subr.mxu0 %v5806_v0 }
 0xc66   : > { %4875 = vmatmul.mubr.msk.f32.vlgmr.msra.gmra.mrb[28].mxu0 %vm1089_vm1, %v6078_v54 }
 0xc67   : > { %4883 = vmatpush3.msra.mxu0 %v6091_v6  ;;  %4884 = vmatprep.mubr.msk.f32.mxu0 %vm5807_vm0, %v5806_v0 }
 0xc68   : > { %5448 = vmatprep.subr.bf16.mxu0 %v5809_v50 }
 0xc6a   : > { %4885 = vmatmul.mubr.msk.f32.vlgmr.msra.gmra.mrb[30].mxu0 %vm1079_vm2, %v6068_v40 }
 0xc6b   : > { %4922 = vmatprep.mubr.msk.f32.mxu0 %vm5807_vm0, %v5806_v0 }
 0xc93   : > { %v2686_v26 = vpop.f32.mrb[26].mxu1 }
 0xc94   : > { %v4871_v27 = vpop.f32.mrb[27].mxu1 }
 0xd35   : > { %v2612_v28 = vpop.f32.mrb[26].mxu0 }
 0xd36   : > { %v2616_v29 = vadd.f32 %v2612_v28, %v6194_v35  ;;  %v4852_v30 = vpop.f32.mrb[27].mxu0  ;;  %v2930_v35 = vld [vmem:[#allocation7 + $0x240] sm:$0xff] }
 0xd37   : > { %v5449_v44 = vpack.c.bf16 %v2931_v43, %v2930_v35  ;;  %v3340_v35 = vld [vmem:[#allocation7 + $0x2e8] sm:$0xff] }
 0xd38   : > { %v6241_v56 = vadd.f32 %v2686_v26, %v2616_v29 }
 0xd39   : > { %v2763_v31 = vpop.f32.mrb[28].mxu0  ;;  %5450 = vmatpush3.bf16.msra.mxu0 %v5449_v44  ;;  %v3341_v44 = vld [vmem:[#allocation7 + $0x2f0] sm:$0xff] }
 0xd3a   : > { %v2767_v32 = vmul.f32 0.125, %v2763_v31  ;;  %v4876_v33 = vpop.f32.mrb[29].mxu0  ;;  %5451 = vmatprep.subr.bf16.mxu0 %v5809_v50  ;;  %v5482_v38 = vpack.c.bf16 %v3342_v45, %v3341_v44  ;;  %v3729_v44 = vld [vmem:[#allocation7 + $0x338] sm:$0xff] }
 0xd3b   : > { %v3335_v33 = vld [vmem:[#allocation7 + $0x2c0] sm:$0xff] }
 0xd3c   : > { %v2768_v34 = vsel %vm1079_vm2, %v2767_v32, -inf }
 0xd3d   : > { %2769 = vmax.xlane.f32.xlu0 %v2768_v34  ;;  %5453 = vmatpush3.bf16.msra.mxu0 %v5452_v22  ;;  %v2918_v7 = vpop.f32.mrb[30].mxu0  ;;  %v3336_v34 = vld [vmem:[#allocation7 + $0x2c8] sm:$0xff]  ;;  %v3327_v22 = vld [vmem:[#allocation7 + $0x280] sm:$0xff] }
 0xd3e   : > { %5454 = vmatprep.subr.bf16.mxu0 %v5809_v50  ;;  %v4886_v10 = vpop.f32.mrb[31].mxu0 }
 0xd41   : > { %5456 = vmatpush3.bf16.msra.mxu0 %v5455_v8 }
 0xd42   : > { %5457 = vmatprep.subr.bf16.mxu0 %v5809_v50 }
 0xd45   : > { %5459 = vmatpush3.bf16.msra.mxu0 %v5458_v4 }
 0xd46   : > { %4930 = vmatprep.subr.mxu0 %v5806_v0 }
 0xd48   : > { %4923 = vmatmul.mubr.msk.f32.vlgmr.msra.gmra.mrb[32].mxu0 %vm1089_vm1, %v2918_v7 }
 0xd49   : > { %4932 = vmatprep.mubr.msk.f32.mxu0 %vm5807_vm0, %v5806_v0 }
 0xdca   : > { %v2770_v36 = vpop.xlane.xlu0 %2769 }
 0xdcb   : > { %v2771_v37 = vsub.f32 %v2767_v32, %v2770_v36  ;;  %v3337_v36 = vld [vmem:[#allocation7 + $0x2d0] sm:$0xff] }
 0xdcd   : > { %v2772_v39 = vmul.f32 1.442695, %v2771_v37  ;;  %v5473_v37 = vpack.c.bf16 %v3336_v34, %v3335_v33 }
 0xdcf   : > { %5626 = vpow2.f32 %v2772_v39  ;;  %v3338_v39 = vld [vmem:[#allocation7 + $0x2d8] sm:$0xff] }
 0xdd9   : > { %v5627_v41 = vpop.eup %5626 }
 0xdda   : > { %v2774_v42 = vsel %vm1079_vm2, %v5627_v41, 0.0 }
 0xddb   : > { %2775 = vadd.xlane.f32.xlu1 %v2774_v42  ;;  %v3339_v42 = vld [vmem:[#allocation7 + $0x2e0] sm:$0xff] }
 0xddc   : > { %v5479_v43 = vpack.c.bf16 %v3340_v35, %v3339_v42  ;;  %v3727_v42 = vld [vmem:[#allocation7 + $0x328] sm:$0xff] }
 0xdec   : > { %3088 = vrot.lane.b32.xlu1 %v6082_v62, %s5808_s21 }
 0xdf0   : > { %3086 = vrot.lane.b32.xlu1 %v6078_v54, %s5808_s21  ;;  %v2922_v54 = vld [vmem:[#allocation7 + $0x200] sm:$0xff] }
 0xdf1   : > { %v5437_v48 = vpack.c.bf16 %v2923_v21, %v2922_v54  ;;  %v3329_v21 = vld [vmem:[#allocation7 + $0x290] sm:$0xff] }
 0xe1b   : > { %v3081_v16 = vpop.f32.mrb[32].mxu0 }
 0xe1c   : > { %v4924_v17 = vpop.f32.mrb[33].mxu0 }
 0xe68   : > { %v2776_v62 = vpop.xlane.xlu1 %2775 }
 0xe69   : > { %5628 = vrcp.f32 %v2776_v62  ;;  %v5461_v62 = vpack.c.bf16 %v3328_v46, %v3327_v22 }
 0xe6c   : > { %v3089_v11 = vpop.permute.xlu1 %3088 }
 0xe70   : > { %v3087_v15 = vpop.permute.xlu1 %3086 }
 0xe73   : > { %v5629_v47 = vpop.eup %5628 }
 0xe74   : > { %v2778_v49 = vmul.f32 %v5629_v47, %v5627_v41  ;;  %v5476_v41 = vpack.c.bf16 %v3338_v39, %v3337_v36  ;;  %v3330_v47 = vld [vmem:[#allocation7 + $0x298] sm:$0xff]  ;;  %v3724_v36 = vld [vmem:[#allocation7 + $0x310] sm:$0xff] }
 0xe76   : > { %4880 = vmatmul.mubr.msk.f32.vlgmr.msra.gmra.mrb[28].mxu1 %vm1079_vm2, %v2778_v49  ;;  %v3331_v49 = vld [vmem:[#allocation7 + $0x2a0] sm:$0xff] }
 0xe77   : > { %5438 = vmatpush3.bf16.msra.mxu1 %v5437_v48  ;;  %4903 = vmatprep.mubr.msk.f32.mxu1 %vm5807_vm0, %v5806_v0  ;;  %v5464_v48 = vpack.c.bf16 %v3330_v47, %v3329_v21  ;;  %v5467_v53 = vpack.c.bf16 %v3332_v52, %v3331_v49 }
 0xe78   : > { %5439 = vmatprep.subr.bf16.mxu1 %v5809_v50 }
 0xe7b   : > { %5441 = vmatpush3.bf16.msra.mxu1 %v5440_v55  ;;  %v3333_v55 = vld [vmem:[#allocation7 + $0x2b0] sm:$0xff] }
 0xe7c   : > { %5442 = vmatprep.subr.bf16.mxu1 %v5809_v50  ;;  %v5470_v58 = vpack.c.bf16 %v3334_v57, %v3333_v55 }
 0xe7f   : > { %5444 = vmatpush3.bf16.msra.mxu1 %v5443_v60 }
 0xe80   : > { %5445 = vmatprep.subr.bf16.mxu1 %v5809_v50 }
 0xe83   : > { %5447 = vmatpush3.bf16.msra.mxu1 %v5446_v61 }
 0xe84   : > { %4925 = vmatprep.subr.mxu1 %v5806_v0 }
 0xf49   : > { %v2848_v13 = vpop.f32.mrb[28].mxu1 }
 0xf4a   : > { %v4881_v14 = vpop.f32.mrb[29].mxu1  ;;  %4904 = vmatmul.mubr.msk.f32.vlgmr.msra.gmra.mrb[30].mxu1 %vm1089_vm1, %v2848_v13 }
 0xf4b   : > { %4926 = vmatpush3.xpose.msk.msra.mxu1 %vm1089_vm1, %v3089_v11  ;;  %4927 = vmatprep.mubr.msk.f32.mxu1 %vm5807_vm0, %v5806_v0 }
 0xf4c   : > { %4935 = vmatprep.subr.mxu1 %v5806_v0 }
 0xf4e   : > { %4928 = vmatmul.mubr.msk.f32.vlgmr.msra.gmra.mrb[32].mxu1 %vm1089_vm1, %v3087_v15 }
 0xf4f   : > { %4937 = vmatprep.mubr.msk.f32.mxu1 %vm5807_vm0, %v5806_v0 }
0x101d   : > { %v3007_v18 = vpop.f32.mrb[30].mxu1 }
0x101e   : > { %v3011_v19 = vadd.f32 %v3007_v18, %v6241_v56  ;;  %v4905_v23 = vpop.f32.mrb[31].mxu1 }
0x1020   : > { %v6272_v24 = vadd.f32 %v3081_v16, %v3011_v19 }
0x1021   : > { %v3160_v25 = vpop.f32.mrb[32].mxu1 }
0x1022   : > { %v3164_v26 = vmul.f32 0.125, %v3160_v25  ;;  %v4929_v27 = vpop.f32.mrb[33].mxu1 }
0x1024   : > { %v3165_v28 = vsel %vm1079_vm2, %v3164_v26, -inf }
0x1025   : > { %3166 = vmax.xlane.f32.xlu0 %v3165_v28  ;;  %v3732_v28 = vld [vmem:[#allocation7 + $0x350] sm:$0xff] }
0x103b   : > { %3177 = vrot.lane.b32.xlu0 %v6086_v2, %s5808_s21 }
0x103f   : > { %3254 = vrot.lane.b32.xlu0 %v6091_v6, %s5808_s21 }
0x10b2   : > { %v3167_v29 = vpop.xlane.xlu0 %3166 }
0x10b3   : > { %v3168_v30 = vsub.f32 %v3164_v26, %v3167_v29  ;;  %v3731_v26 = vld [vmem:[#allocation7 + $0x348] sm:$0xff]  ;;  %v3733_v29 = vld [vmem:[#allocation7 + $0x358] sm:$0xff] }
0x10b5   : > { %v3169_v31 = vmul.f32 1.442695, %v3168_v30  ;;  %v3734_v30 = vld [vmem:[#allocation7 + $0x360] sm:$0xff] }
0x10b6   : > { %v3178_v32 = vpop.permute.xlu0 %3177 }
0x10b7   : > { %5630 = vpow2.f32 %v3169_v31  ;;  %4931 = vmatpush3.msra.mxu0 %v3178_v32  ;;  %v5500_v31 = vpack.c.bf16 %v3733_v29, %v3732_v28  ;;  %v3735_v32 = vld [vmem:[#allocation7 + $0x368] sm:$0xff]  ;;  %v4129_v28 = vld [vmem:[#allocation7 + $0x390] sm:$0xff]  ;;  %v4130_v29 = vld [vmem:[#allocation7 + $0x398] sm:$0xff] }
0x10b8   : > { %5460 = vmatprep.subr.bf16.mxu0 %v5809_v50 }
0x10ba   : > { %v3255_v56 = vpop.permute.xlu0 %3254 }
0x10bb   : > { %4936 = vmatpush3.msra.mxu1 %v3255_v56  ;;  %v5503_v56 = vpack.c.bf16 %v3735_v32, %v3734_v30  ;;  %v5512_v30 = vpack.c.bf16 %v4130_v29, %v4129_v28  ;;  %v4132_v32 = vld [vmem:[#allocation7 + $0x3a8] sm:$0xff] }
0x10bc   : > { %4938 = vmatmul.mubr.msk.f32.vlgmr.msra.gmra.mrb[34].mxu1 %vm1079_vm2, %v6068_v40  ;;  %5472 = vmatprep.subr.bf16.mxu1 %v5809_v50 }
0x10bd   : > { %4975 = vmatprep.mubr.msk.f32.mxu1 %vm5807_vm0, %v5806_v0  ;;  %5474 = vmatpush3.bf16.msra.mxu1 %v5473_v37  ;;  %v3725_v37 = vld [vmem:[#allocation7 + $0x318] sm:$0xff] }
0x10be   : > { %5475 = vmatprep.subr.bf16.mxu1 %v5809_v50  ;;  %v5488_v39 = vpack.c.bf16 %v3725_v37, %v3724_v36 }
0x10c1   : > { %v5631_v2 = vpop.eup %5630  ;;  %5477 = vmatpush3.bf16.msra.mxu1 %v5476_v41  ;;  %v3726_v41 = vld [vmem:[#allocation7 + $0x320] sm:$0xff] }
0x10c2   : > { %v3171_v6 = vsel %vm1079_vm2, %v5631_v2, 0.0  ;;  %5478 = vmatprep.subr.bf16.mxu1 %v5809_v50  ;;  %v5491_v35 = vpack.c.bf16 %v3727_v42, %v3726_v41 }
0x10c3   : > { %3172 = vadd.xlane.f32.xlu1 %v3171_v6 }
0x10c5   : > { %5480 = vmatpush3.bf16.msra.mxu1 %v5479_v43  ;;  %v3728_v43 = vld [vmem:[#allocation7 + $0x330] sm:$0xff] }
0x10c6   : > { %5481 = vmatprep.subr.bf16.mxu1 %v5809_v50  ;;  %v5494_v45 = vpack.c.bf16 %v3729_v44, %v3728_v43  ;;  %v4463_v44 = vld [vmem:[%s6432_s3] ss:$0 sm:$0xff] }
0x10c9   : > { %5483 = vmatpush3.bf16.msra.mxu1 %v5482_v38  ;;  %v3736_v38 = vld [vmem:[#allocation7 + $0x370] sm:$0xff] }
0x10ca   : > { %4983 = vmatprep.subr.mxu1 %v5806_v0 }
0x1150   : > { %v3173_v12 = vpop.xlane.xlu1 %3172 }
0x1151   : > { %5632 = vrcp.f32 %v3173_v12  ;;  %v3737_v12 = vld [vmem:[#allocation7 + $0x378] sm:$0xff] }
0x1152   : > { %v5506_v22 = vpack.c.bf16 %v3737_v12, %v3736_v38 }
0x115b   : > { %v5633_v8 = vpop.eup %5632 }
0x115c   : > { %v3175_v54 = vmul.f32 %v5633_v8, %v5631_v2  ;;  %v3723_v2 = vld [vmem:[#allocation7 + $0x308] sm:$0xff] }
0x115e   : > { %4933 = vmatmul.mubr.msk.f32.vlgmr.msra.gmra.mrb[34].mxu0 %vm1079_vm2, %v3175_v54 }
0x115f   : > { %5462 = vmatpush3.bf16.msra.mxu0 %v5461_v62  ;;  %4956 = vmatprep.mubr.msk.f32.mxu0 %vm5807_vm0, %v5806_v0 }
0x1160   : > { %5463 = vmatprep.subr.bf16.mxu0 %v5809_v50 }
0x1163   : > { %5465 = vmatpush3.bf16.msra.mxu0 %v5464_v48 }
0x1164   : > { %5466 = vmatprep.subr.bf16.mxu0 %v5809_v50 }
0x1167   : > { %5468 = vmatpush3.bf16.msra.mxu0 %v5467_v53 }
0x1168   : > { %5469 = vmatprep.subr.bf16.mxu0 %v5809_v50 }
0x116b   : > { %5471 = vmatpush3.bf16.msra.mxu0 %v5470_v58 }
0x116c   : > { %4978 = vmatprep.subr.mxu0 %v5806_v0 }
0x118f   : > { %v3323_v60 = vpop.f32.mrb[34].mxu1 }
0x1190   : > { %4976 = vmatmul.mubr.msk.f32.vlgmr.msra.gmra.mrb[36].mxu1 %vm1089_vm1, %v3323_v60  ;;  %v4939_v20 = vpop.f32.mrb[35].mxu1 }
0x1191   : > { %4984 = vmatpush3.msra.mxu1 %v6089_v5  ;;  %4985 = vmatprep.mubr.msk.f32.mxu1 %vm5807_vm0, %v5806_v0 }
0x1192   : > { %5484 = vmatprep.subr.bf16.mxu1 %v5809_v50 }
0x1231   : > { %v3249_v51 = vpop.f32.mrb[34].mxu0 }
0x1232   : > { %v4934_v61 = vpop.f32.mrb[35].mxu0  ;;  %4957 = vmatmul.mubr.msk.f32.vlgmr.msra.gmra.mrb[36].mxu0 %vm1089_vm1, %v3249_v51 }
0x1233   : > { %4979 = vmatpush3.xpose.msk.msra.mxu0 %vm1089_vm1, %v6084_v63  ;;  %4980 = vmatprep.mubr.msk.f32.mxu0 %vm5807_vm0, %v5806_v0 }
0x1234   : > { %4988 = vmatprep.subr.mxu0 %v5806_v0 }
0x1236   : > { %4981 = vmatmul.mubr.msk.f32.vlgmr.msra.gmra.mrb[38].mxu0 %vm1089_vm1, %v6080_v59 }
0x1237   : > { %4989 = vmatpush3.msra.mxu0 %v6093_v9  ;;  %4990 = vmatprep.mubr.msk.f32.mxu0 %vm5807_vm0, %v5806_v0 }
0x1238   : > { %5496 = vmatprep.subr.bf16.mxu0 %v5809_v50 }
0x123a   : > { %4991 = vmatmul.mubr.msk.f32.vlgmr.msra.gmra.mrb[40].mxu0 %vm1079_vm2, %v6068_v40 }
0x123b   : > { %5028 = vmatprep.mubr.msk.f32.mxu0 %vm5807_vm0, %v5806_v0 }
0x1263   : > { %v3486_v1 = vpop.f32.mrb[36].mxu1 }
0x1264   : > { %v4977_v3 = vpop.f32.mrb[37].mxu1 }
0x1305   : > { %v3412_v4 = vpop.f32.mrb[36].mxu0 }
0x1306   : > { %v3416_v7 = vadd.f32 %v3412_v4, %v6272_v24  ;;  %v4958_v10 = vpop.f32.mrb[37].mxu0  ;;  %v3730_v24 = vld [vmem:[#allocation7 + $0x340] sm:$0xff] }
0x1307   : > { %v5497_v27 = vpack.c.bf16 %v3731_v26, %v3730_v24  ;;  %v4135_v10 = vld [vmem:[#allocation7 + $0x3c0] sm:$0xff] }
0x1308   : > { %v6319_v11 = vadd.f32 %v3486_v1, %v3416_v7 }
0x1309   : > { %v3563_v13 = vpop.f32.mrb[38].mxu0  ;;  %5498 = vmatpush3.bf16.msra.mxu0 %v5497_v27 }
0x130a   : > { %v3567_v14 = vmul.f32 0.125, %v3563_v13  ;;  %v4982_v15 = vpop.f32.mrb[39].mxu0  ;;  %5499 = vmatprep.subr.bf16.mxu0 %v5809_v50 }
0x130b   : > { %v4138_v15 = vld [vmem:[#allocation7 + $0x3d8] sm:$0xff] }
0x130c   : > { %v3568_v16 = vsel %vm1079_vm2, %v3567_v14, -inf }
0x130d   : > { %3569 = vmax.xlane.f32.xlu0 %v3568_v16  ;;  %5501 = vmatpush3.bf16.msra.mxu0 %v5500_v31  ;;  %v3718_v46 = vpop.f32.mrb[40].mxu0  ;;  %v4131_v31 = vld [vmem:[#allocation7 + $0x3a0] sm:$0xff] }
0x130e   : > { %5502 = vmatprep.subr.bf16.mxu0 %v5809_v50  ;;  %v4992_v8 = vpop.f32.mrb[41].mxu0 }
0x1311   : > { %5504 = vmatpush3.bf16.msra.mxu0 %v5503_v56  ;;  %v5515_v56 = vpack.c.bf16 %v4132_v32, %v4131_v31 }
0x1312   : > { %5505 = vmatprep.subr.bf16.mxu0 %v5809_v50 }
0x1315   : > { %5507 = vmatpush3.bf16.msra.mxu0 %v5506_v22 }
0x1316   : > { %5036 = vmatprep.subr.mxu0 %v5806_v0 }
0x1318   : > { %5029 = vmatmul.mubr.msk.f32.vlgmr.msra.gmra.mrb[42].mxu0 %vm1089_vm1, %v3718_v46 }
0x1319   : > { %5038 = vmatprep.mubr.msk.f32.mxu0 %vm5807_vm0, %v5806_v0 }
0x139a   : > { %v3570_v17 = vpop.xlane.xlu0 %3569 }
0x139b   : > { %v3571_v18 = vsub.f32 %v3567_v14, %v3570_v17  ;;  %v4137_v14 = vld [vmem:[#allocation7 + $0x3d0] sm:$0xff]  ;;  %v4140_v17 = vld [vmem:[#allocation7 + $0x3e8] sm:$0xff] }
0x139c   : > { %v5524_v16 = vpack.c.bf16 %v4138_v15, %v4137_v14 }
0x139d   : > { %v3572_v19 = vmul.f32 1.442695, %v3571_v18 }
0x139f   : > { %5634 = vpow2.f32 %v3572_v19 }
0x13a9   : > { %v5635_v23 = vpop.eup %5634 }
0x13aa   : > { %v3574_v25 = vsel %vm1079_vm2, %v5635_v23, 0.0 }
0x13ab   : > { %3575 = vadd.xlane.f32.xlu1 %v3574_v25  ;;  %v4128_v25 = vld [vmem:[#allocation7 + $0x388] sm:$0xff] }
0x13bc   : > { %3888 = vrot.lane.b32.xlu1 %v6084_v63, %s5808_s21 }
0x13c0   : > { %3886 = vrot.lane.b32.xlu1 %v6080_v59, %s5808_s21  ;;  %v3722_v59 = vld [vmem:[#allocation7 + $0x300] sm:$0xff] }
0x13c1   : > { %v5485_v33 = vpack.c.bf16 %v3723_v2, %v3722_v59  ;;  %v4134_v59 = vld [vmem:[#allocation7 + $0x3b8] sm:$0xff] }
0x13eb   : > { %v3881_v48 = vpop.f32.mrb[42].mxu0 }
0x13ec   : > { %v5030_v49 = vpop.f32.mrb[43].mxu0 }
0x1438   : > { %v3576_v63 = vpop.xlane.xlu1 %3575 }
0x1439   : > { %5636 = vrcp.f32 %v3576_v63  ;;  %v4133_v63 = vld [vmem:[#allocation7 + $0x3b0] sm:$0xff] }
0x143a   : > { %v5518_v2 = vpack.c.bf16 %v4134_v59, %v4133_v63 }
0x143c   : > { %v3889_v62 = vpop.permute.xlu1 %3888 }
0x1440   : > { %v3887_v47 = vpop.permute.xlu1 %3886 }
0x1443   : > { %v5637_v6 = vpop.eup %5636 }
0x1444   : > { %v3578_v34 = vmul.f32 %v5637_v6, %v5635_v23  ;;  %v4127_v23 = vld [vmem:[#allocation7 + $0x380] sm:$0xff]  ;;  %v4141_v6 = vld [vmem:[#allocation7 + $0x3f0] sm:$0xff] }
0x1445   : > { %v5509_v26 = vpack.c.bf16 %v4128_v25, %v4127_v23 }
0x1446   : > { %4986 = vmatmul.mubr.msk.f32.vlgmr.msra.gmra.mrb[38].mxu1 %vm1079_vm2, %v3578_v34 }
0x1447   : > { %5486 = vmatpush3.bf16.msra.mxu1 %v5485_v33  ;;  %5009 = vmatprep.mubr.msk.f32.mxu1 %vm5807_vm0, %v5806_v0  ;;  %v4142_v33 = vld [vmem:[#allocation7 + $0x3f8] sm:$0xff] }
0x1448   : > { %5487 = vmatprep.subr.bf16.mxu1 %v5809_v50 }
0x144b   : > { %5489 = vmatpush3.bf16.msra.mxu1 %v5488_v39 }
0x144c   : > { %5490 = vmatprep.subr.bf16.mxu1 %v5809_v50 }
0x144f   : > { %5492 = vmatpush3.bf16.msra.mxu1 %v5491_v35 }
0x1450   : > { %5493 = vmatprep.subr.bf16.mxu1 %v5809_v50 }
0x1453   : > { %5495 = vmatpush3.bf16.msra.mxu1 %v5494_v45 }
0x1454   : > { %5031 = vmatprep.subr.mxu1 %v5806_v0 }
0x1519   : > { %v3648_v54 = vpop.f32.mrb[38].mxu1 }
0x151a   : > { %v4987_v21 = vpop.f32.mrb[39].mxu1  ;;  %5010 = vmatmul.mubr.msk.f32.vlgmr.msra.gmra.mrb[40].mxu1 %vm1089_vm1, %v3648_v54 }
0x151b   : > { %5032 = vmatpush3.xpose.msk.msra.mxu1 %vm1089_vm1, %v3889_v62  ;;  %5033 = vmatprep.mubr.msk.f32.mxu1 %vm5807_vm0, %v5806_v0 }
0x151c   : > { %5041 = vmatprep.subr.mxu1 %v5806_v0 }
0x151e   : > { %5034 = vmatmul.mubr.msk.f32.vlgmr.msra.gmra.mrb[42].mxu1 %vm1089_vm1, %v3887_v47 }
0x151f   : > { %5043 = vmatprep.mubr.msk.f32.mxu1 %vm5807_vm0, %v5806_v0 }
0x15ed   : > { %v3807_v52 = vpop.f32.mrb[40].mxu1 }
0x15ee   : > { %v3811_v53 = vadd.f32 %v3807_v52, %v6319_v11  ;;  %v5011_v55 = vpop.f32.mrb[41].mxu1  ;;  %v4136_v11 = vld [vmem:[#allocation7 + $0x3c8] sm:$0xff] }
0x15ef   : > { %v5521_v13 = vpack.c.bf16 %v4136_v11, %v4135_v10 }
0x15f0   : > { %v6350_v57 = vadd.f32 %v3881_v48, %v3811_v53 }
0x15f1   : > { %v3960_v58 = vpop.f32.mrb[42].mxu1 }
0x15f2   : > { %v3964_v60 = vmul.f32 0.125, %v3960_v58  ;;  %v5035_v20 = vpop.f32.mrb[43].mxu1 }
0x15f4   : > { %v3965_v51 = vsel %vm1079_vm2, %v3964_v60, -inf }
0x15f5   : > { %3966 = vmax.xlane.f32.xlu0 %v3965_v51 }
0x160b   : > { %3977 = vrot.lane.b32.xlu0 %v6089_v5, %s5808_s21 }
0x160f   : > { %4054 = vrot.lane.b32.xlu0 %v6093_v9, %s5808_s21 }
0x1682   : > { %v3967_v61 = vpop.xlane.xlu0 %3966 }
0x1683   : > { %v3968_v1 = vsub.f32 %v3964_v60, %v3967_v61 }
0x1685   : > { %v3969_v3 = vmul.f32 1.442695, %v3968_v1 }
0x1686   : > { %v3978_v4 = vpop.permute.xlu0 %3977 }
0x1687   : > { %5638 = vpow2.f32 %v3969_v3  ;;  %5037 = vmatpush3.msra.mxu0 %v3978_v4 }
0x1688   : > { %5508 = vmatprep.subr.bf16.mxu0 %v5809_v50 }
0x168a   : > { %v4055_v7 = vpop.permute.xlu0 %4054 }
0x168b   : > { %5042 = vmatpush3.msra.mxu1 %v4055_v7 }
0x168c   : > { %5044 = vmatmul.mubr.msk.f32.vlgmr.msra.gmra.mrb[44].mxu1 %vm1079_vm2, %v6068_v40  ;;  %5520 = vmatprep.subr.bf16.mxu1 %v5809_v50  ;;  %v4139_v40 = vld [vmem:[#allocation7 + $0x3e0] sm:$0xff] }
0x168d   : > { %5081 = vmatprep.mubr.msk.f32.mxu1 %vm5807_vm0, %v5806_v0  ;;  %5522 = vmatpush3.bf16.msra.mxu1 %v5521_v13  ;;  %v5527_v18 = vpack.c.bf16 %v4140_v17, %v4139_v40 }
0x168e   : > { %5523 = vmatprep.subr.bf16.mxu1 %v5809_v50 }
0x1691   : > { %v5639_v5 = vpop.eup %5638  ;;  %5525 = vmatpush3.bf16.msra.mxu1 %v5524_v16 }
0x1692   : > { %v3971_v9 = vsel %vm1079_vm2, %v5639_v5, 0.0  ;;  %5526 = vmatprep.subr.bf16.mxu1 %v5809_v50 }
0x1693   : > { %3972 = vadd.xlane.f32.xlu1 %v3971_v9 }
0x1695   : > { %5528 = vmatpush3.bf16.msra.mxu1 %v5527_v18 }
0x1696   : > { %5529 = vmatprep.subr.bf16.mxu1 %v5809_v50 }
0x1720   : > { %v3973_v19 = vpop.xlane.xlu1 %3972 }
0x1721   : > { %5640 = vrcp.f32 %v3973_v19 }
0x172b   : > { %v5641_v24 = vpop.eup %5640 }
0x172c   : > { %v3975_v27 = vmul.f32 %v5641_v24, %v5639_v5 }
0x172e   : > { %5039 = vmatmul.mubr.msk.f32.vlgmr.msra.gmra.mrb[44].mxu0 %vm1079_vm2, %v3975_v27 }
0x172f   : > { %5510 = vmatpush3.bf16.msra.mxu0 %v5509_v26  ;;  %5062 = vmatprep.mubr.msk.f32.mxu0 %vm5807_vm0, %v5806_v0  ;;  %v5530_v0 = vpack.c.bf16 %v4142_v33, %v4141_v6 }
0x1730   : > { %5511 = vmatprep.subr.bf16.mxu0 %v5809_v50 }
0x1731   : > { %5531 = vmatpush3.bf16.msra.mxu1 %v5530_v0 }
0x1733   : > { %5513 = vmatpush3.bf16.msra.mxu0 %v5512_v30 }
0x1734   : > { %5514 = vmatprep.subr.bf16.mxu0 %v5809_v50 }
0x1737   : > { %5516 = vmatpush3.bf16.msra.mxu0 %v5515_v56 }
0x1738   : > { %5517 = vmatprep.subr.bf16.mxu0 %v5809_v50 }
0x173b   : > { %5519 = vmatpush3.bf16.msra.mxu0 %v5518_v2 }
0x175f   : > { %v4123_v34 = vpop.f32.mrb[44].mxu1 }
0x1760   : > { %v5045_v36 = vpop.f32.mrb[45].mxu1  ;;  %5082 = vmatmul.mubr.msk.f32.vlgmr.msra.gmra.mrb[46].mxu1 %vm1089_vm1, %v4123_v34 }
0x1801   : > { %v4049_v37 = vpop.f32.mrb[44].mxu0 }
0x1802   : > { %v5040_v39 = vpop.f32.mrb[45].mxu0  ;;  %5063 = vmatmul.mubr.msk.f32.vlgmr.msra.gmra.mrb[46].mxu0 %vm1089_vm1, %v4049_v37 }
0x1833   : > { %v4286_v41 = vpop.f32.mrb[46].mxu1 }
0x1834   : > { %v5083_v42 = vpop.f32.mrb[47].mxu1 }
0x18d5   : > { %v4212_v50 = vpop.f32.mrb[46].mxu0 }
0x18d6   : > { %v4216_v35 = vadd.f32 %v4212_v50, %v6350_v57  ;;  %v5064_v43 = vpop.f32.mrb[47].mxu0 }
0x18d8   : > { %v4290_v45 = vadd.f32 %v4286_v41, %v4216_v35 }
0x18da   : > { %v4298_v38 = vadd.f32 %v4463_v44, %v4290_v45 }
0x18dc   : > { %4299 = vst [vmem:[%s241_s6] sm:$0xff] %v4298_v38 }
0x18dd   : > { %5741 = shalt.err (!%p5738_p2)
}
0x18de   : > { %s5742_s30 = scalar_lea.hbm %s6385_s24, 128  ;;  %s5746_s9 = scalar_lea.hbm %s6433_s4, 256 }
0x18df   : > { %p5743_p13 = scmp.ne.s32.totalorder %s6385_s24, %s5742_s30  ;;  %p5747_p4 = scmp.lt.u32.totalorder %s6385_s24, %s6433_s4 }
0x18e0   : > { %p5748_p9 = scmp.lt.u32.totalorder %s5746_s9, %s5742_s30  ;;  %p5750_p11 = scmp.lt.u32.totalorder %s5742_s30, %s6385_s24 }
0x18e1   : > { %p5744_p6 = pnand %p5743_p13, %p6447_p0 }
0x18e2   : > { %p5749_p8 = por %p5748_p9, %p5747_p4 }
0x18e3   : > { %p5745_p10 = pneg %p5744_p6 }
0x18e4   : > { %p5751_p1 = por %p5750_p11, %p5749_p8 }
0x18e6   : > { %p5752_p3 = pnand %p5751_p1, %p5745_p10 }
0x18e8   : > { %5755 = shalt.err (!%p5752_p3)
}
0x18e9   : > { %5542 = dma.vmem_to_hbm [thread:$0]  (%p6447_p0), %s6387_s25, 128, %s6385_s24, %s4301_s20  }
0x18ea PF: > { %s4326_s29 = sand.u32 1, %s5786_s15   ;;  %p6448_p5 = scmp.ne.s32.totalorder %s6438_s22, 0 }
0x18eb   : > { %p6449_p7 = scmp.ge.s32.totalorder %s5798_s18, 2  ;;  %s4327_s5 = scalar_lea.sflag [#allocation4], %s4326_s29 }
0x18ed   : > { %p5556_p12 = pnand %p6449_p7, %p6448_p5 }
0x18ef   : > { %5781 = dma.done.wait (!%p5556_p12), %s4327_s5, 128  }
0x18f0   : > { %5783 = vsyncadd (!%p5556_p12), %s4327_s5, 4294967168  ;;  %p18_p2 = scmp.ge.s32.totalorder %s5946_s10, 4   ;;  %s6450_s15 = smov %s5790_s16 }
0x18f1   : > { %s6451_s16 = smov %s5794_s17  ;;  %s6452_s17 = smov %s5956_s13 }
0x18f2   : > { %s6453_s18 = smov %s5946_s10  ;;  %20 = sbr.rel (!%p18_p2) target bundleno = 6 (0x6), region = 89 }
0x18f9   :  { %4332 = vsyncpa [#allocation3], 1 }
0x18fa   :  { %4334 = vsyncpa [#allocation3 + $0x1], 1 }
0x18fb   :  { %4335 = vsyncpa [#allocation6], 1 }
0x18fc   :  { %4336 = vsyncpa [#allocation4], 1 }
0x18fd   :  { %4338 = vsyncpa [#allocation4 + $0x1], 1 }

</bundles_post_ra>
